<compile_context>
chip_gen: v7x
topology: tpu7x:2x2x1
jax: 0.10.0
libtpu: 0.0.40
codegen_flags: <defaults>
</compile_context>

<pallas_src>
import math

import jax
import jax.numpy as jnp
from jax.experimental import pallas as pl
from jax.experimental.pallas import tpu as pltpu

LANE = 128      # TPU lane width (last-dim tiling / store granularity)
SUBLANE = 16    # sublane granularity for bf16-packed rows (also valid for f32)


def _round_up(x, m):
    return ((x + m - 1) // m) * m


def _vmem_budget_bytes():
    """~75% of physical VMEM: leaves headroom for compiler scratch / semaphores.
    v5e/v6e (128 MiB) -> 96 MiB; v7x (64 MiB) -> 48 MiB; safe 48 MiB fallback."""
    phys = 64 << 20
    try:
        phys = int(pltpu.get_tpu_info().vmem_capacity_bytes)
    except Exception:
        pass
    return (phys * 3) // 4


# --------------------------------------------------------------------------- kernels

def mlp_kernel_resident(x_ref, w1_ref, b1_ref, w2_ref, b2_ref, o_ref):
    # Cast x in-kernel (VPU) -> no separate XLA astype pass over x in HBM.
    x = x_ref[...].astype(w1_ref.dtype)
    # Linear 1 on the MXU: bf16 operands, f32 accumulation.
    h = jnp.dot(x, w1_ref[...], preferred_element_type=jnp.float32)
    # Bias + ReLU in f32 on the VPU.
    h = jnp.maximum(h + b1_ref[...], 0.0)
    # Linear 2: bf16 LHS for full MXU rate; accumulation stays f32.
    out = jnp.dot(h.astype(w2_ref.dtype), w2_ref[...],
                  preferred_element_type=jnp.float32)
    o_ref[...] = (out + b2_ref[...]).astype(o_ref.dtype)


def mlp_kernel_fred(x_ref, w1_ref, b1_ref, w2_ref, b2_ref, o_ref, acc_ref):
    # Feature-dim reduction variant: grid = (batch_tiles, F_tiles), F axis "arbitrary".
    f = pl.program_id(1)

    @pl.when(f == 0)
    def _():
        acc_ref[...] = jnp.zeros_like(acc_ref)

    x = x_ref[...].astype(w1_ref.dtype)
    h = jnp.dot(x, w1_ref[...], preferred_element_type=jnp.float32)
    h = jnp.maximum(h + b1_ref[...], 0.0)                       # ReLU is per-F-column
    acc_ref[...] += jnp.dot(h.astype(w2_ref.dtype), w2_ref[...],
                            preferred_element_type=jnp.float32)

    @pl.when(f == pl.num_programs(1) - 1)
    def _():
        o_ref[...] = (acc_ref[...] + b2_ref[...]).astype(o_ref.dtype)


# --------------------------------------------------------------------------- wrapper

def base_classifier_forward(x, w1, b1, w2, b2, *, batch_tile=None, feature_tile=None,
                            compute_dtype=jnp.bfloat16, out_dtype=jnp.float32):
    """x: (B, in_dim); w1: (in_dim, F); b1: (F,); w2: (F, out_dim); b2: (out_dim,)."""
    B, in_dim = x.shape
    F = w1.shape[1]
    out_dim = w2.shape[1]
    out_pad = _round_up(out_dim, LANE)      # lane-dense output -> unmasked vst

    itemsize_c = jnp.dtype(compute_dtype).itemsize
    itemsize_x = jnp.dtype(x.dtype).itemsize
    itemsize_o = jnp.dtype(out_dtype).itemsize

    vmem_budget = _vmem_budget_bytes()

    # ---- resident-weights vs. F-reduction path ------------------------------------
    resident_weight_bytes = (in_dim * F + F * out_pad) * itemsize_c + (F + out_pad) * 4
    use_fred = (feature_tile is not None) or (resident_weight_bytes > vmem_budget // 3)

    if use_fred:
        if feature_tile is None:
            # Largest multiple of 128 whose weight slab fits in ~1/3 of the budget
            # (x2: the default pipeline double-buffers the weight blocks).
            per_col = 2 * ((in_dim + out_pad) * itemsize_c + 4)
            feature_tile = max(LANE, ((vmem_budget // 3) // per_col) // LANE * LANE)
        tile_f = max(LANE, min(_round_up(feature_tile, LANE), _round_up(F, LANE)))
        F_pad = _round_up(F, tile_f)        # zero-padded F slabs contribute exactly 0
    else:
        tile_f = F
        F_pad = F

    # ---- batch tile: biggest tile that fits the budget (up to 1024 rows) -----------
    per_row = (2 * in_dim * itemsize_x            # double-buffered x tile (f32 in HBM)
               + in_dim * itemsize_c              # in-kernel bf16 copy of x
               + 2 * out_pad * itemsize_o         # double-buffered out tile
               + tile_f * (4 + itemsize_c)        # h (f32) + bf16 copy
               + (out_pad * 4 if use_fred else 0))  # f32 accumulator scratch
    fixed = (2 * (in_dim * tile_f + tile_f * out_pad) * itemsize_c
             + 2 * (tile_f + out_pad) * 4)

    if batch_tile is None:
        avail = max(vmem_budget - fixed, per_row * SUBLANE)
        max_rows = max(SUBLANE, int(avail // per_row))
        batch_tile = min(_round_up(B, SUBLANE), 1024, (max_rows // SUBLANE) * SUBLANE)
        batch_tile = max(SUBLANE, batch_tile)
        # v7x megacore: prefer an even number of grid steps when there is more than one.
        gb = pl.cdiv(B, batch_tile)
        if gb > 1 and gb % 2 == 1:
            batch_tile = max(SUBLANE, _round_up(pl.cdiv(B, gb + 1), SUBLANE))
    else:
        batch_tile = max(SUBLANE, _round_up(batch_tile, SUBLANE))

    B_pad = _round_up(B, batch_tile)
    grid_b = B_pad // batch_tile

    # ---- parameter plumbing (tiny; fuses under jit) ---------------------------------
    w1_c = w1.astype(compute_dtype)
    w2_c = w2.astype(compute_dtype)
    b1_f = b1.astype(jnp.float32)
    b2_f = b2.astype(jnp.float32)
    if out_pad != out_dim:
        w2_c = jnp.pad(w2_c, ((0, 0), (0, out_pad - out_dim)))
        b2_f = jnp.pad(b2_f, (0, out_pad - out_dim))
    if F_pad != F:
        w1_c = jnp.pad(w1_c, ((0, 0), (0, F_pad - F)))
        b1_f = jnp.pad(b1_f, (0, F_pad - F))
        w2_c = jnp.pad(w2_c, ((0, F_pad - F), (0, 0)))
    b1_2d = b1_f.reshape(1, F_pad)
    b2_2d = b2_f.reshape(1, out_pad)
    # NOTE: padded batch rows hold garbage (relu(b1)@W2 + b2) and are sliced off below.
    x_in = x if B_pad == B else jnp.pad(x, ((0, B_pad - B), (0, 0)))

    # ---- scheduler hint ---------------------------------------------------------------
    flops = 2 * B_pad * in_dim * F_pad + 2 * B_pad * F_pad * out_pad
    bytes_accessed = int(x_in.size * itemsize_x
                         + (w1_c.size + w2_c.size) * itemsize_c
                         + (b1_2d.size + b2_2d.size) * 4
                         + B_pad * out_pad * itemsize_o)
    cost = pl.CostEstimate(flops=int(flops), transcendentals=0,
                           bytes_accessed=bytes_accessed)

    # ---- pallas_call ------------------------------------------------------------------
    if not use_fred:
        grid = (grid_b,)
        in_specs = [
            pl.BlockSpec((batch_tile, in_dim), lambda i: (i, 0)),    # x tile
            pl.BlockSpec((in_dim, F_pad), lambda i: (0, 0)),         # W1 resident
            pl.BlockSpec((1, F_pad), lambda i: (0, 0)),              # b1
            pl.BlockSpec((F_pad, out_pad), lambda i: (0, 0)),        # W2 resident
            pl.BlockSpec((1, out_pad), lambda i: (0, 0)),            # b2
        ]
        out_specs = pl.BlockSpec((batch_tile, out_pad), lambda i: (i, 0))
        kernel = mlp_kernel_resident
        scratch = []
        dims = ("parallel",)
    else:
        grid = (grid_b, F_pad // tile_f)
        in_specs = [
            pl.BlockSpec((batch_tile, in_dim), lambda i, f: (i, 0)),
            pl.BlockSpec((in_dim, tile_f), lambda i, f: (0, f)),
            pl.BlockSpec((1, tile_f), lambda i, f: (0, f)),
            pl.BlockSpec((tile_f, out_pad), lambda i, f: (f, 0)),
            pl.BlockSpec((1, out_pad), lambda i, f: (0, 0)),
        ]
        out_specs = pl.BlockSpec((batch_tile, out_pad), lambda i, f: (i, 0))
        kernel = mlp_kernel_fred
        scratch = [pltpu.VMEM((batch_tile, out_pad), jnp.float32)]
        dims = ("parallel", "arbitrary")

    out_padded = pl.pallas_call(
        kernel,
        out_shape=jax.ShapeDtypeStruct((B_pad, out_pad), out_dtype),
        grid_spec=pltpu.PrefetchScalarGridSpec(
            num_scalar_prefetch=0,
            grid=grid,
            in_specs=in_specs,
            out_specs=out_specs,
            scratch_shapes=scratch,
        ),
        compiler_params=pltpu.CompilerParams(
            dimension_semantics=dims,
            vmem_limit_bytes=int(vmem_budget),
        ),
        cost_estimate=cost,
    )(x_in, w1_c, b1_2d, w2_c, b2_2d)

    return out_padded[:B, :out_dim]


def reference_forward(x, w1, b1, w2, b2, compute_dtype=jnp.bfloat16):
    """Mirrors the kernel's dtype path (bf16 matmul operands, f32 accumulation)."""
    xc = x.astype(compute_dtype).astype(jnp.float32)
    w1c = w1.astype(compute_dtype).astype(jnp.float32)
    w2c = w2.astype(compute_dtype).astype(jnp.float32)
    h = jnp.maximum(xc @ w1c + b1.astype(jnp.float32), 0.0)
    hc = h.astype(compute_dtype).astype(jnp.float32)
    return hc @ w2c + b2.astype(jnp.float32)


if __name__ == "__main__":
    # Small shapes consistent with BaseClassifier(in_dim, feature_dim, out_dim).
    B, in_dim, feature_dim, out_dim = 512, 32, 256, 16

    key = jax.random.PRNGKey(0)
    kx, k1, k2, k3, k4 = jax.random.split(key, 5)

    x = jax.random.normal(kx, (B, in_dim), dtype=jnp.float32)

    # Deterministic parameter init (nn.Linear-style uniform scale).
    lim1 = 1.0 / math.sqrt(in_dim)
    lim2 = 1.0 / math.sqrt(feature_dim)
    w1 = jax.random.uniform(k1, (in_dim, feature_dim), jnp.float32, -lim1, lim1)
    b1 = jax.random.uniform(k2, (feature_dim,), jnp.float32, -lim1, lim1)
    w2 = jax.random.uniform(k3, (feature_dim, out_dim), jnp.float32, -lim2, lim2)
    b2 = jax.random.uniform(k4, (out_dim,), jnp.float32, -lim2, lim2)

    # Main path: resident weights, one big 512-row batch tile (grid=(1,)).
    fwd = jax.jit(base_classifier_forward)
    out = jax.block_until_ready(fwd(x, w1, b1, w2, b2))
    assert out.shape == (B, out_dim)

    ref = reference_forward(x, w1, b1, w2, b2)
    max_err = float(jnp.max(jnp.abs(out - ref)))
    assert jnp.allclose(out, ref, atol=2e-3, rtol=2e-3), f"mismatch vs reference: {max_err}"

    # Loose sanity check vs. pure-f32 PyTorch semantics (bf16 rounding only).
    ref_f32 = jnp.maximum(x @ w1 + b1, 0.0) @ w2 + b2
    assert jnp.allclose(out, ref_f32, atol=5e-2, rtol=5e-2), "drifted from f32 semantics"

    # Also exercise the F-reduction path (tile_f=128 -> 2 "arbitrary" reduction steps).
    fwd_fred = jax.jit(lambda *a: base_classifier_forward(*a, feature_tile=128))
    out_fred = jax.block_until_ready(fwd_fred(x, w1, b1, w2, b2))
    err_fred = float(jnp.max(jnp.abs(out_fred - ref)))
    assert jnp.allclose(out_fred, ref, atol=2e-3, rtol=2e-3), f"fred mismatch: {err_fred}"

    print("KERNEL_OK")
</pallas_src>

<mosaic_0001>
module attributes {stable_mosaic.version = 11 : i64} {
  func.func @mlp_kernel_resident(%arg0: i32, %arg1: memref<512x32xf32, #tpu.memory_space<vmem>>, %arg2: memref<32x256xbf16, #tpu.memory_space<vmem>>, %arg3: memref<1x256xf32, #tpu.memory_space<vmem>>, %arg4: memref<256x128xbf16, #tpu.memory_space<vmem>>, %arg5: memref<1x128xf32, #tpu.memory_space<vmem>>, %arg6: memref<512x128xf32, #tpu.memory_space<vmem>>) attributes {dimension_semantics = [#tpu.dimension_semantics<parallel>], iteration_bounds = array<i64: 1>, scalar_prefetch = 0 : i64, scratch_operands = 0 : i64, tpu.core_type = #tpu.core_type<tc>, window_params = [{transform_indices = @transform_0, window_bounds = array<i64: 512, 32>}, {pipeline_mode = #tpu.pipeline_mode<synchronous>, transform_indices = @transform_1, window_bounds = array<i64: 32, 256>}, {pipeline_mode = #tpu.pipeline_mode<synchronous>, transform_indices = @transform_2, window_bounds = array<i64: 1, 256>}, {pipeline_mode = #tpu.pipeline_mode<synchronous>, transform_indices = @transform_3, window_bounds = array<i64: 256, 128>}, {pipeline_mode = #tpu.pipeline_mode<synchronous>, transform_indices = @transform_4, window_bounds = array<i64: 1, 128>}, {transform_indices = @transform_5, window_bounds = array<i64: 512, 128>}]} {
    %c0 = arith.constant 0 : index
    %c0_0 = arith.constant 0 : index
    %0 = vector.load %arg1[%c0, %c0_0] : memref<512x32xf32, #tpu.memory_space<vmem>>, vector<512x32xf32>
    %1 = arith.truncf %0 : vector<512x32xf32> to vector<512x32xbf16>
    %c0_1 = arith.constant 0 : index
    %c0_2 = arith.constant 0 : index
    %2 = vector.load %arg2[%c0_1, %c0_2] : memref<32x256xbf16, #tpu.memory_space<vmem>>, vector<32x256xbf16>
    %cst = arith.constant dense<0.000000e+00> : vector<512x256xf32>
    %3 = tpu.matmul %1, %2, %cst {dimension_numbers = #tpu.dot_dimension_numbers<[1], [0], [0], [1], [0, 0, 1, 1], [], []>} : vector<512x32xbf16>, vector<32x256xbf16>, vector<512x256xf32> -> vector<512x256xf32>
    %c0_3 = arith.constant 0 : index
    %c0_4 = arith.constant 0 : index
    %4 = vector.load %arg3[%c0_3, %c0_4] : memref<1x256xf32, #tpu.memory_space<vmem>>, vector<1x256xf32>
    %5 = vector.broadcast %4 : vector<1x256xf32> to vector<512x256xf32>
    %6 = arith.addf %3, %5 : vector<512x256xf32>
    %cst_5 = arith.constant 0.000000e+00 : f32
    %7 = vector.broadcast %cst_5 : f32 to vector<512x256xf32>
    %8 = arith.maximumf %6, %7 : vector<512x256xf32>
    %9 = arith.truncf %8 : vector<512x256xf32> to vector<512x256xbf16>
    %c0_6 = arith.constant 0 : index
    %c0_7 = arith.constant 0 : index
    %10 = vector.load %arg4[%c0_6, %c0_7] : memref<256x128xbf16, #tpu.memory_space<vmem>>, vector<256x128xbf16>
    %cst_8 = arith.constant dense<0.000000e+00> : vector<512x128xf32>
    %11 = tpu.matmul %9, %10, %cst_8 {dimension_numbers = #tpu.dot_dimension_numbers<[1], [0], [0], [1], [0, 0, 1, 1], [], []>} : vector<512x256xbf16>, vector<256x128xbf16>, vector<512x128xf32> -> vector<512x128xf32>
    %c0_9 = arith.constant 0 : index
    %c0_10 = arith.constant 0 : index
    %12 = vector.load %arg5[%c0_9, %c0_10] : memref<1x128xf32, #tpu.memory_space<vmem>>, vector<1x128xf32>
    %13 = vector.broadcast %12 : vector<1x128xf32> to vector<512x128xf32>
    %14 = arith.addf %11, %13 : vector<512x128xf32>
    %c0_11 = arith.constant 0 : index
    %c0_12 = arith.constant 0 : index
    %15 = vector.load %arg6[%c0_11, %c0_12] : memref<512x128xf32, #tpu.memory_space<vmem>>, vector<512x128xf32>
    tpu.vector_store %arg6[%c0_11, %c0_12], %14 {strides = array<i32>} : memref<512x128xf32, #tpu.memory_space<vmem>>, vector<512x128xf32>,
    return
  }
  func.func @transform_0(%arg0: i32) -> (i32, i32) {
    %c0_i32 = arith.constant 0 : i32
    %c0_i32_0 = arith.constant 0 : i32
    return %arg0, %c0_i32 : i32, i32
  }
  func.func @transform_1(%arg0: i32) -> (i32, i32) {
    %c0_i32 = arith.constant 0 : i32
    %c0_i32_0 = arith.constant 0 : i32
    %c0_i32_1 = arith.constant 0 : i32
    return %c0_i32, %c0_i32_0 : i32, i32
  }
  func.func @transform_2(%arg0: i32) -> (i32, i32) {
    %c0_i32 = arith.constant 0 : i32
    %c0_i32_0 = arith.constant 0 : i32
    %c0_i32_1 = arith.constant 0 : i32
    return %c0_i32, %c0_i32_0 : i32, i32
  }
  func.func @transform_3(%arg0: i32) -> (i32, i32) {
    %c0_i32 = arith.constant 0 : i32
    %c0_i32_0 = arith.constant 0 : i32
    %c0_i32_1 = arith.constant 0 : i32
    return %c0_i32, %c0_i32_0 : i32, i32
  }
  func.func @transform_4(%arg0: i32) -> (i32, i32) {
    %c0_i32 = arith.constant 0 : i32
    %c0_i32_0 = arith.constant 0 : i32
    %c0_i32_1 = arith.constant 0 : i32
    return %c0_i32, %c0_i32_0 : i32, i32
  }
  func.func @transform_5(%arg0: i32) -> (i32, i32) {
    %c0_i32 = arith.constant 0 : i32
    %c0_i32_0 = arith.constant 0 : i32
    return %arg0, %c0_i32 : i32, i32
  }
}

</mosaic_0001>

<bundles_post_ra>
// kernel: base_classifier_forward.1
= control target key start
LH: loop header
LB: loop body
LE: loop exit
PB: predicated region body
PF: predicated region fallthrough
CT: control target
= control target key end

     0   :  { %v1395_v1 = vmov 0   ;;  %vm153_vm0 = vcmask 261120   ;;  %s2188_s1 = inlined_call_operand.vmem [shape: bf16[32,256], index: 1, kind: input, shape index: {}]   ;;  %s2189_s0 = inlined_call_operand.vmem [shape: f32[512,32], index: 0, kind: input, shape index: {}]   ;;  %s2190_s3 = inlined_call_operand.vmem [shape: bf16[256,128], index: 3, kind: input, shape index: {}]   ;;  %s2191_s2 = inlined_call_operand.vmem [shape: f32[1,256], index: 2, kind: input, shape index: {}]   ;;  %s2192_s4 = inlined_call_operand.vmem [shape: f32[1,128], index: 4, kind: input, shape index: {}]   ;;  %s2193_s5 = inlined_call_operand.vmem [shape: f32[512,128], index: 5, kind: output, shape index: {}]  }
   0x1   :  { %v1373_v0 = vld [vmem:[%s2188_s1 + $0x4] ss:$8 sps:$4 sm:$0xff]   ;;  %282 = vmatprep.mubr.bf16.mxu0 %v1395_v1  ;;  %1340 = vmatprep.subr.bf16.mxu1 %v1395_v1  ;;  %v1375_v2 = vld [vmem:[%s2188_s1] ss:$8 sps:$4 sm:$0xff]   ;;  %v1376_v3 = vld [vmem:[%s2188_s1 + $0x14] ss:$8 sps:$4 sm:$0xff]  }
   0x2   :  { %250 = vmatprep.subr.bf16.mxu0 %v1373_v0  ;;  %v1378_v4 = vld [vmem:[%s2188_s1 + $0x10] ss:$8 sps:$4 sm:$0xff]   ;;  %v21_v5 = vld [vmem:[%s2189_s0] sm:$0xff]  ;;  %v22_v6 = vld [vmem:[%s2189_s0 + $0x8] sm:$0xff] }
   0x3   :  { %251 = vmatpush1.bf16.msra.mxu0 %v1375_v2  ;;  %v85_v7 = vpack.c.bf16 %v22_v6, %v21_v5  ;;  %v23_v8 = vld [vmem:[%s2189_s0 + $0x10] sm:$0xff]  ;;  %v24_v9 = vld [vmem:[%s2189_s0 + $0x18] sm:$0xff]  ;;  %v25_v11 = vld [vmem:[%s2189_s0 + $0x20] sm:$0xff] }
   0x4   :  { %252 = vmatprep.subr.bf16.mxu0 %v1376_v3  ;;  %v86_v10 = vpack.c.bf16 %v24_v9, %v23_v8  ;;  %v26_v12 = vld [vmem:[%s2189_s0 + $0x28] sm:$0xff]  ;;  %v27_v14 = vld [vmem:[%s2189_s0 + $0x30] sm:$0xff]  ;;  %v28_v15 = vld [vmem:[%s2189_s0 + $0x38] sm:$0xff] }
   0x5   :  { %v87_v13 = vpack.c.bf16 %v26_v12, %v25_v11  ;;  %v88_v16 = vpack.c.bf16 %v28_v15, %v27_v14  ;;  %v29_v17 = vld [vmem:[%s2189_s0 + $0x40] sm:$0xff]  ;;  %v30_v18 = vld [vmem:[%s2189_s0 + $0x48] sm:$0xff]  ;;  %v31_v20 = vld [vmem:[%s2189_s0 + $0x50] sm:$0xff] }
   0x6   :  { %v89_v19 = vpack.c.bf16 %v30_v18, %v29_v17  ;;  %v32_v21 = vld [vmem:[%s2189_s0 + $0x58] sm:$0xff]  ;;  %v33_v23 = vld [vmem:[%s2189_s0 + $0x60] sm:$0xff]  ;;  %v34_v24 = vld [vmem:[%s2189_s0 + $0x68] sm:$0xff] }
   0x7   :  { %253 = vmatpush1.bf16.msra.mxu0 %v1378_v4  ;;  %v90_v22 = vpack.c.bf16 %v32_v21, %v31_v20  ;;  %v91_v25 = vpack.c.bf16 %v34_v24, %v33_v23  ;;  %v35_v26 = vld [vmem:[%s2189_s0 + $0x70] sm:$0xff]  ;;  %v36_v27 = vld [vmem:[%s2189_s0 + $0x78] sm:$0xff]  ;;  %v1379_v28 = vld [vmem:[%s2190_s3] sm:$0xff]  }
   0x8   :  { %930 = vmatprep.subr.bf16.mxu0 %v1395_v1  ;;  %v92_v29 = vpack.c.bf16 %v36_v27, %v35_v26  ;;  %1356 = vmatpush1.bf16.msra.mxu1 %v1379_v28  ;;  %v1380_v30 = vld [vmem:[%s2190_s3 + $0x8] sm:$0xff]   ;;  %v37_v31 = vld [vmem:[%s2189_s0 + $0x80] sm:$0xff]  ;;  %v1381_v33 = vld [vmem:[%s2190_s3 + $0x10] sm:$0xff]  }
   0x9   :  { %1341 = vmatprep.subr.bf16.mxu1 %v1395_v1  ;;  %v38_v32 = vld [vmem:[%s2189_s0 + $0x88] sm:$0xff]  ;;  %v1382_v35 = vld [vmem:[%s2190_s3 + $0x18] sm:$0xff]   ;;  %v39_v36 = vld [vmem:[%s2189_s0 + $0x90] sm:$0xff] }
   0xa   :  { %1291 = vmatmul.mubr.msk.bf16.vlgmr.msra.gmra.mrb[0].mxu0 %vm153_vm0, %v85_v7  ;;  %v93_v34 = vpack.c.bf16 %v38_v32, %v37_v31  ;;  %v40_v37 = vld [vmem:[%s2189_s0 + $0x98] sm:$0xff]  ;;  %v1383_v38 = vld [vmem:[%s2190_s3 + $0x20] sm:$0xff]   ;;  %v1384_v40 = vld [vmem:[%s2190_s3 + $0x28] sm:$0xff]  }
   0xb   :  { %292 = vmatprep.mubr.bf16.mxu0 %v1395_v1  ;;  %931 = vmatpush1.bf16.msra.mxu0 %v1379_v28  ;;  %v94_v39 = vpack.c.bf16 %v40_v37, %v39_v36  ;;  %v41_v41 = vld [vmem:[%s2189_s0 + $0xa0] sm:$0xff]  ;;  %v42_v42 = vld [vmem:[%s2189_s0 + $0xa8] sm:$0xff]  ;;  %v1385_v43 = vld [vmem:[%s2190_s3 + $0x30] sm:$0xff]   ;;  %v123_v36 = vlaneseq }
   0xc   :  { %932 = vmatprep.subr.bf16.mxu0 %v1395_v1  ;;  %1357 = vmatpush1.bf16.msra.mxu1 %v1380_v30  ;;  %v95_v44 = vpack.c.bf16 %v42_v42, %v41_v41  ;;  %v43_v45 = vld [vmem:[%s2189_s0 + $0xb0] sm:$0xff]  ;;  %v44_v46 = vld [vmem:[%s2189_s0 + $0xb8] sm:$0xff]  ;;  %v1387_v49 = vld [vmem:[%s2190_s3 + $0x40] sm:$0xff]  }
   0xd   :  { %1342 = vmatprep.subr.bf16.mxu1 %v1395_v1  ;;  %v1386_v47 = vld [vmem:[%s2190_s3 + $0x38] sm:$0xff]   ;;  %v96_v48 = vpack.c.bf16 %v44_v46, %v43_v45  ;;  %v45_v50 = vld [vmem:[%s2189_s0 + $0xc0] sm:$0xff]  ;;  %v46_v51 = vld [vmem:[%s2189_s0 + $0xc8] sm:$0xff]  ;;  %v124_v37 = vshrl.u32 %v123_v36, 7 }
   0xe   :  { %v1388_v52 = vld [vmem:[%s2190_s3 + $0x48] sm:$0xff]   ;;  %v97_v53 = vpack.c.bf16 %v46_v51, %v45_v50  ;;  %v1389_v54 = vld [vmem:[%s2190_s3 + $0x50] sm:$0xff]   ;;  %v48_v56 = vld [vmem:[%s2189_s0 + $0xd8] sm:$0xff] }
   0xf   :  { %933 = vmatpush1.bf16.msra.mxu0 %v1380_v30  ;;  %v47_v55 = vld [vmem:[%s2189_s0 + $0xd0] sm:$0xff]  ;;  %v1390_v57 = vld [vmem:[%s2190_s3 + $0x58] sm:$0xff]   ;;  %v1391_v59 = vld [vmem:[%s2190_s3 + $0x60] sm:$0xff]   ;;  %v125_v41 = vsub.s32 0, %v124_v37 }
  0x10   :  { %934 = vmatprep.subr.bf16.mxu0 %v1395_v1  ;;  %1358 = vmatpush1.bf16.msra.mxu1 %v1381_v33  ;;  %v98_v58 = vpack.c.bf16 %v48_v56, %v47_v55  ;;  %v49_v60 = vld [vmem:[%s2189_s0 + $0xe0] sm:$0xff]  ;;  %v50_v61 = vld [vmem:[%s2189_s0 + $0xe8] sm:$0xff]  ;;  %v1393_v0 = vld [vmem:[%s2190_s3 + $0x70] sm:$0xff]  }
  0x11   :  { %1343 = vmatprep.subr.bf16.mxu1 %v1395_v1  ;;  %v1392_v62 = vld [vmem:[%s2190_s3 + $0x68] sm:$0xff]   ;;  %v99_v63 = vpack.c.bf16 %v50_v61, %v49_v60  ;;  %v51_v2 = vld [vmem:[%s2189_s0 + $0xf0] sm:$0xff]  ;;  %v52_v3 = vld [vmem:[%s2189_s0 + $0xf8] sm:$0xff] }
  0x12   :  { %1292 = vmatmul.mubr.msk.bf16.gmra.mrb[4].mxu0 %vm153_vm0, %v86_v10  ;;  %v1394_v4 = vld [vmem:[%s2190_s3 + $0x78] sm:$0xff]   ;;  %v100_v5 = vpack.c.bf16 %v52_v3, %v51_v2  ;;  %v53_v6 = vld [vmem:[%s2189_s0 + $0x100] sm:$0xff]  ;;  %v54_v7 = vld [vmem:[%s2189_s0 + $0x108] sm:$0xff] }
  0x13   :  { %302 = vmatprep.mubr.bf16.mxu0 %v1395_v1  ;;  %935 = vmatpush1.bf16.msra.mxu0 %v1381_v33  ;;  %v101_v8 = vpack.c.bf16 %v54_v7, %v53_v6  ;;  %v55_v9 = vld [vmem:[%s2189_s0 + $0x110] sm:$0xff]  ;;  %v56_v10 = vld [vmem:[%s2189_s0 + $0x118] sm:$0xff]  ;;  %v57_v12 = vld [vmem:[%s2189_s0 + $0x120] sm:$0xff] }
  0x14   :  { %936 = vmatprep.subr.bf16.mxu0 %v1395_v1  ;;  %1359 = vmatpush1.bf16.msra.mxu1 %v1382_v35  ;;  %v102_v11 = vpack.c.bf16 %v56_v10, %v55_v9  ;;  %v59_v15 = vld [vmem:[%s2189_s0 + $0x130] sm:$0xff]  ;;  %v61_v18 = vld [vmem:[%s2189_s0 + $0x140] sm:$0xff]  ;;  %v68_v28 = vld [vmem:[%s2189_s0 + $0x178] sm:$0xff] }
  0x15   :  { %1344 = vmatprep.subr.bf16.mxu1 %v1395_v1  ;;  %v63_v21 = vld [vmem:[%s2189_s0 + $0x150] sm:$0xff]  ;;  %v65_v24 = vld [vmem:[%s2189_s0 + $0x160] sm:$0xff]  ;;  %v70_v31 = vld [vmem:[%s2189_s0 + $0x188] sm:$0xff] }
  0x16   :  { %v67_v27 = vld [vmem:[%s2189_s0 + $0x170] sm:$0xff]  ;;  %v69_v30 = vld [vmem:[%s2189_s0 + $0x180] sm:$0xff] }
  0x17   :  { %937 = vmatpush1.bf16.msra.mxu0 %v1382_v35  ;;  %v109_v32 = vpack.c.bf16 %v70_v31, %v69_v30  ;;  %v71_v33 = vld [vmem:[%s2189_s0 + $0x190] sm:$0xff]  ;;  %v121_v42 = vld [vmem:[%s2191_s2] sm:$0x3] }
  0x18   :  { %938 = vmatprep.subr.bf16.mxu0 %v1395_v1  ;;  %1360 = vmatpush1.bf16.msra.mxu1 %v1383_v38  ;;  %v75_v46 = vld [vmem:[%s2189_s0 + $0x1b0] sm:$0xff]  ;;  %v77_v61 = vld [vmem:[%s2189_s0 + $0x1c0] sm:$0xff] }
  0x19   :  { %1345 = vmatprep.subr.bf16.mxu1 %v1395_v1 }
  0x1a   :  { %1293 = vmatmul.mubr.msk.bf16.gmra.mrb[8].mxu0 %vm153_vm0, %v87_v13  ;;  %v58_v13 = vld [vmem:[%s2189_s0 + $0x128] sm:$0xff] }
  0x1b   :  { %312 = vmatprep.mubr.bf16.mxu0 %v1395_v1  ;;  %939 = vmatpush1.bf16.msra.mxu0 %v1383_v38  ;;  %v103_v14 = vpack.c.bf16 %v58_v13, %v57_v12  ;;  %v73_v38 = vld [vmem:[%s2189_s0 + $0x1a0] sm:$0xff] }
  0x1c   :  { %940 = vmatprep.subr.bf16.mxu0 %v1395_v1  ;;  %1361 = vmatpush1.bf16.msra.mxu1 %v1384_v40 }
  0x1d   :  { %1346 = vmatprep.subr.bf16.mxu1 %v1395_v1 }
  0x1f   :  { %941 = vmatpush1.bf16.msra.mxu0 %v1384_v40 }
  0x20   :  { %942 = vmatprep.subr.bf16.mxu0 %v1395_v1  ;;  %1362 = vmatpush1.bf16.msra.mxu1 %v1385_v43 }
  0x21   :  { %1347 = vmatprep.subr.bf16.mxu1 %v1395_v1 }
  0x22   :  { %1294 = vmatmul.mubr.msk.bf16.gmra.mrb[12].mxu0 %vm153_vm0, %v88_v16  ;;  %v60_v16 = vld [vmem:[%s2189_s0 + $0x138] sm:$0xff] }
  0x23   :  { %322 = vmatprep.mubr.bf16.mxu0 %v1395_v1  ;;  %943 = vmatpush1.bf16.msra.mxu0 %v1385_v43  ;;  %v104_v17 = vpack.c.bf16 %v60_v16, %v59_v15  ;;  %v129_v43 = vsub.s32 1, %v124_v37  ;;  %v79_v15 = vld [vmem:[%s2189_s0 + $0x1d0] sm:$0xff]  ;;  %v80_v16 = vld [vmem:[%s2189_s0 + $0x1d8] sm:$0xff] }
  0x24   :  { %944 = vmatprep.subr.bf16.mxu0 %v1395_v1  ;;  %1363 = vmatpush1.bf16.msra.mxu1 %v1386_v47 }
  0x25   :  { %1348 = vmatprep.subr.bf16.mxu1 %v1395_v1  ;;  %v1739_v45 = vrot.slane %v121_v42, %v129_v43 }
  0x27   :  { %945 = vmatpush1.bf16.msra.mxu0 %v1386_v47  ;;  %v76_v47 = vld [vmem:[%s2189_s0 + $0x1b8] sm:$0xff] }
  0x28   :  { %946 = vmatprep.subr.bf16.mxu0 %v1395_v1  ;;  %1364 = vmatpush1.bf16.msra.mxu1 %v1387_v49  ;;  %v112_v51 = vpack.c.bf16 %v76_v47, %v75_v46 }
  0x29   :  { %1349 = vmatprep.subr.bf16.mxu1 %v1395_v1 }
  0x2a   :  { %1295 = vmatmul.mubr.msk.bf16.gmra.mrb[16].mxu0 %vm153_vm0, %v89_v19  ;;  %v62_v19 = vld [vmem:[%s2189_s0 + $0x148] sm:$0xff] }
  0x2b   :  { %332 = vmatprep.mubr.bf16.mxu0 %v1395_v1  ;;  %947 = vmatpush1.bf16.msra.mxu0 %v1387_v49  ;;  %v105_v20 = vpack.c.bf16 %v62_v19, %v61_v18 }
  0x2c   :  { %948 = vmatprep.subr.bf16.mxu0 %v1395_v1  ;;  %1365 = vmatpush1.bf16.msra.mxu1 %v1388_v52 }
  0x2d   :  { %1350 = vmatprep.subr.bf16.mxu1 %v1395_v1 }
  0x2f   :  { %949 = vmatpush1.bf16.msra.mxu0 %v1388_v52 }
  0x30   :  { %950 = vmatprep.subr.bf16.mxu0 %v1395_v1  ;;  %1366 = vmatpush1.bf16.msra.mxu1 %v1389_v54 }
  0x31   :  { %1351 = vmatprep.subr.bf16.mxu1 %v1395_v1 }
  0x32   :  { %1296 = vmatmul.mubr.msk.bf16.gmra.mrb[20].mxu0 %vm153_vm0, %v90_v22  ;;  %v64_v22 = vld [vmem:[%s2189_s0 + $0x158] sm:$0xff] }
  0x33   :  { %342 = vmatprep.mubr.bf16.mxu0 %v1395_v1  ;;  %951 = vmatpush1.bf16.msra.mxu0 %v1389_v54  ;;  %v106_v23 = vpack.c.bf16 %v64_v22, %v63_v21  ;;  %v114_v22 = vpack.c.bf16 %v80_v16, %v79_v15 }
  0x34   :  { %952 = vmatprep.subr.bf16.mxu0 %v1395_v1  ;;  %1367 = vmatpush1.bf16.msra.mxu1 %v1390_v57 }
  0x35   :  { %1352 = vmatprep.subr.bf16.mxu1 %v1395_v1 }
  0x37   :  { %953 = vmatpush1.bf16.msra.mxu0 %v1390_v57 }
  0x38   :  { %954 = vmatprep.subr.bf16.mxu0 %v1395_v1  ;;  %1368 = vmatpush1.bf16.msra.mxu1 %v1391_v59 }
  0x39   :  { %1353 = vmatprep.subr.bf16.mxu1 %v1395_v1 }
  0x3a   :  { %1297 = vmatmul.mubr.msk.bf16.gmra.mrb[24].mxu0 %vm153_vm0, %v91_v25  ;;  %v66_v25 = vld [vmem:[%s2189_s0 + $0x168] sm:$0xff] }
  0x3b   :  { %352 = vmatprep.mubr.bf16.mxu0 %v1395_v1  ;;  %955 = vmatpush1.bf16.msra.mxu0 %v1391_v59  ;;  %v107_v26 = vpack.c.bf16 %v66_v25, %v65_v24 }
  0x3c   :  { %956 = vmatprep.subr.bf16.mxu0 %v1395_v1  ;;  %1369 = vmatpush1.bf16.msra.mxu1 %v1392_v62 }
  0x3d   :  { %1354 = vmatprep.subr.bf16.mxu1 %v1395_v1 }
  0x3f   :  { %957 = vmatpush1.bf16.msra.mxu0 %v1392_v62  ;;  %v78_v62 = vld [vmem:[%s2189_s0 + $0x1c8] sm:$0xff] }
  0x40   :  { %958 = vmatprep.subr.bf16.mxu0 %v1395_v1  ;;  %1370 = vmatpush1.bf16.msra.mxu1 %v1393_v0 }
  0x41   :  { %1355 = vmatprep.subr.bf16.mxu1 %v1395_v1 }
  0x42   :  { %1298 = vmatmul.mubr.msk.bf16.gmra.mrb[28].mxu0 %vm153_vm0, %v92_v29  ;;  %v108_v29 = vpack.c.bf16 %v68_v28, %v67_v27 }
  0x43   :  { %362 = vmatprep.mubr.bf16.mxu0 %v1395_v1  ;;  %959 = vmatpush1.bf16.msra.mxu0 %v1393_v0 }
  0x44   :  { %960 = vmatprep.subr.bf16.mxu0 %v1395_v1  ;;  %1371 = vmatpush1.bf16.msra.mxu1 %v1394_v4 }
  0x47   :  { %961 = vmatpush1.bf16.msra.mxu0 %v1394_v4 }
  0x4a   :  { %1299 = vmatmul.mubr.msk.bf16.gmra.mrb[32].mxu0 %vm153_vm0, %v93_v34  ;;  %v72_v34 = vld [vmem:[%s2189_s0 + $0x198] sm:$0xff] }
  0x4b   :  { %372 = vmatprep.mubr.bf16.mxu0 %v1395_v1  ;;  %v110_v35 = vpack.c.bf16 %v72_v34, %v71_v33  ;;  %v82_v33 = vld [vmem:[%s2189_s0 + $0x1e8] sm:$0xff] }
  0x52   :  { %1300 = vmatmul.mubr.msk.bf16.gmra.mrb[36].mxu0 %vm153_vm0, %v94_v39  ;;  %v74_v39 = vld [vmem:[%s2189_s0 + $0x1a8] sm:$0xff] }
  0x53   :  { %382 = vmatprep.mubr.bf16.mxu0 %v1395_v1  ;;  %v111_v40 = vpack.c.bf16 %v74_v39, %v73_v38 }
  0x5a   :  { %1301 = vmatmul.mubr.msk.bf16.gmra.mrb[40].mxu0 %vm153_vm0, %v95_v44  ;;  %v1737_v44 = vrot.slane %v121_v42, %v125_v41 }
  0x5b   :  { %392 = vmatprep.mubr.bf16.mxu0 %v1395_v1 }
  0x62   :  { %1302 = vmatmul.mubr.msk.bf16.gmra.mrb[44].mxu0 %vm153_vm0, %v96_v48 }
  0x63   :  { %402 = vmatprep.mubr.bf16.mxu0 %v1395_v1 }
  0x6a   :  { %1303 = vmatmul.mubr.msk.bf16.gmra.mrb[48].mxu0 %vm153_vm0, %v97_v53 }
  0x6b   :  { %412 = vmatprep.mubr.bf16.mxu0 %v1395_v1 }
  0x72   :  { %1304 = vmatmul.mubr.msk.bf16.gmra.mrb[52].mxu0 %vm153_vm0, %v98_v58 }
  0x73   :  { %422 = vmatprep.mubr.bf16.mxu0 %v1395_v1 }
  0x7a   :  { %1305 = vmatmul.mubr.msk.bf16.gmra.mrb[56].mxu0 %vm153_vm0, %v99_v63 }
  0x7b   :  { %432 = vmatprep.mubr.bf16.mxu0 %v1395_v1 }
  0x82   :  { %1306 = vmatmul.mubr.msk.bf16.gmra.mrb[60].mxu0 %vm153_vm0, %v100_v5  ;;  %v113_v5 = vpack.c.bf16 %v78_v62, %v77_v61 }
  0x83   :  { %442 = vmatprep.mubr.bf16.mxu0 %v1395_v1 }
  0x8a   :  { %1307 = vmatmul.mubr.msk.bf16.gmra.mrb[64].mxu0 %vm153_vm0, %v101_v8 }
  0x8b   :  { %452 = vmatprep.mubr.bf16.mxu0 %v1395_v1 }
  0x92   :  { %1308 = vmatmul.mubr.msk.bf16.gmra.mrb[68].mxu0 %vm153_vm0, %v102_v11 }
  0x93   :  { %462 = vmatprep.mubr.bf16.mxu0 %v1395_v1 }
  0x9a   :  { %1309 = vmatmul.mubr.msk.bf16.gmra.mrb[72].mxu0 %vm153_vm0, %v103_v14 }
  0x9b   :  { %472 = vmatprep.mubr.bf16.mxu0 %v1395_v1 }
  0xa2   :  { %1310 = vmatmul.mubr.msk.bf16.gmra.mrb[76].mxu0 %vm153_vm0, %v104_v17 }
  0xa3   :  { %482 = vmatprep.mubr.bf16.mxu0 %v1395_v1 }
  0xaa   :  { %1311 = vmatmul.mubr.msk.bf16.gmra.mrb[80].mxu0 %vm153_vm0, %v105_v20 }
  0xab   :  { %492 = vmatprep.mubr.bf16.mxu0 %v1395_v1 }
  0xb2   :  { %1312 = vmatmul.mubr.msk.bf16.gmra.mrb[84].mxu0 %vm153_vm0, %v106_v23 }
  0xb3   :  { %502 = vmatprep.mubr.bf16.mxu0 %v1395_v1 }
  0xba   :  { %1313 = vmatmul.mubr.msk.bf16.gmra.mrb[88].mxu0 %vm153_vm0, %v107_v26 }
  0xbb   :  { %512 = vmatprep.mubr.bf16.mxu0 %v1395_v1 }
  0xc2   :  { %1314 = vmatmul.mubr.msk.bf16.gmra.mrb[92].mxu0 %vm153_vm0, %v108_v29 }
  0xc3   :  { %522 = vmatprep.mubr.bf16.mxu0 %v1395_v1 }
  0xca   :  { %1315 = vmatmul.mubr.msk.bf16.gmra.mrb[96].mxu0 %vm153_vm0, %v109_v32  ;;  %v81_v32 = vld [vmem:[%s2189_s0 + $0x1e0] sm:$0xff] }
  0xcb   :  { %532 = vmatprep.mubr.bf16.mxu0 %v1395_v1  ;;  %v115_v39 = vpack.c.bf16 %v82_v33, %v81_v32 }
  0xd2   :  { %1316 = vmatmul.mubr.msk.bf16.gmra.mrb[100].mxu0 %vm153_vm0, %v110_v35 }
  0xd3   :  { %542 = vmatprep.mubr.bf16.mxu0 %v1395_v1 }
  0xda   :  { %1317 = vmatmul.mubr.msk.bf16.gmra.mrb[104].mxu0 %vm153_vm0, %v111_v40 }
  0xdb   :  { %552 = vmatprep.mubr.bf16.mxu0 %v1395_v1 }
  0xdd   :  { %v284_v48 = vpop.f32.mrb[0].mxu0 }
  0xde   :  { %v285_v49 = vadd.f32 %v284_v48, %v1737_v44  ;;  %v286_v50 = vpop.f32.mrb[1].mxu0 }
  0xdf   :  { %v287_v52 = vadd.f32 %v286_v50, %v1739_v45  ;;  %v288_v53 = vpop.f32.mrb[2].mxu0 }
  0xe0   :  { %v289_v54 = vadd.f32 %v288_v53, %v1737_v44  ;;  %v290_v55 = vpop.f32.mrb[3].mxu0  ;;  %v603_v57 = vmax.f32 %v285_v49, 0.0 }
  0xe1   :  { %v291_v56 = vadd.f32 %v290_v55, %v1739_v45  ;;  %v604_v59 = vmax.f32 %v287_v52, 0.0  ;;  %v84_v52 = vld [vmem:[%s2189_s0 + $0x1f8] sm:$0xff] }
  0xe2   :  { %v605_v58 = vmax.f32 %v289_v54, 0.0  ;;  %1318 = vmatmul.mubr.msk.bf16.gmra.mrb[108].mxu0 %vm153_vm0, %v112_v51  ;;  %v83_v51 = vld [vmem:[%s2189_s0 + $0x1f0] sm:$0xff] }
  0xe3   :  { %v606_v60 = vmax.f32 %v291_v56, 0.0  ;;  %562 = vmatprep.mubr.bf16.mxu0 %v1395_v1 }
  0xe4   :  { %v1760_v63 = vpack.c.bf16 %v605_v58, %v603_v57  ;;  %v116_v58 = vpack.c.bf16 %v84_v52, %v83_v51 }
  0xe5   :  { %v1762_v0 = vpack.c.bf16 %v606_v60, %v604_v59  ;;  %v294_v2 = vpop.f32.mrb[4].mxu0 }
  0xe6   :  { %v295_v3 = vadd.f32 %v294_v2, %v1737_v44  ;;  %v296_v4 = vpop.f32.mrb[5].mxu0 }
  0xe7   :  { %v297_v6 = vadd.f32 %v296_v4, %v1739_v45  ;;  %v298_v7 = vpop.f32.mrb[6].mxu0 }
  0xe8   :  { %v299_v8 = vadd.f32 %v298_v7, %v1737_v44  ;;  %v300_v9 = vpop.f32.mrb[7].mxu0  ;;  %v607_v11 = vmax.f32 %v295_v3, 0.0 }
  0xe9   :  { %v301_v10 = vadd.f32 %v300_v9, %v1739_v45  ;;  %v608_v13 = vmax.f32 %v297_v6, 0.0 }
  0xea   :  { %v609_v12 = vmax.f32 %v299_v8, 0.0  ;;  %1319 = vmatmul.mubr.msk.bf16.gmra.mrb[112].mxu0 %vm153_vm0, %v113_v5 }
  0xeb   :  { %v610_v14 = vmax.f32 %v301_v10, 0.0  ;;  %572 = vmatprep.mubr.bf16.mxu0 %v1395_v1 }
  0xec   :  { %v1776_v17 = vpack.c.bf16 %v609_v12, %v607_v11 }
  0xed   :  { %v1778_v18 = vpack.c.bf16 %v610_v14, %v608_v13  ;;  %v304_v19 = vpop.f32.mrb[8].mxu0 }
  0xee   :  { %v305_v20 = vadd.f32 %v304_v19, %v1737_v44  ;;  %v306_v21 = vpop.f32.mrb[9].mxu0 }
  0xef   :  { %v307_v23 = vadd.f32 %v306_v21, %v1739_v45  ;;  %v308_v24 = vpop.f32.mrb[10].mxu0 }
  0xf0   :  { %v309_v25 = vadd.f32 %v308_v24, %v1737_v44  ;;  %v310_v26 = vpop.f32.mrb[11].mxu0  ;;  %v611_v28 = vmax.f32 %v305_v20, 0.0 }
  0xf1   :  { %v311_v27 = vadd.f32 %v310_v26, %v1739_v45  ;;  %v612_v30 = vmax.f32 %v307_v23, 0.0 }
  0xf2   :  { %v613_v29 = vmax.f32 %v309_v25, 0.0  ;;  %1320 = vmatmul.mubr.msk.bf16.gmra.mrb[116].mxu0 %vm153_vm0, %v114_v22 }
  0xf3   :  { %v614_v31 = vmax.f32 %v311_v27, 0.0  ;;  %582 = vmatprep.mubr.bf16.mxu0 %v1395_v1 }
  0xf4   :  { %v1792_v34 = vpack.c.bf16 %v613_v29, %v611_v28 }
  0xf5   :  { %v1794_v35 = vpack.c.bf16 %v614_v31, %v612_v30  ;;  %v314_v36 = vpop.f32.mrb[12].mxu0 }
  0xf6   :  { %v315_v37 = vadd.f32 %v314_v36, %v1737_v44  ;;  %v316_v38 = vpop.f32.mrb[13].mxu0 }
  0xf7   :  { %v317_v40 = vadd.f32 %v316_v38, %v1739_v45  ;;  %v318_v41 = vpop.f32.mrb[14].mxu0 }
  0xf8   :  { %v319_v42 = vadd.f32 %v318_v41, %v1737_v44  ;;  %v320_v43 = vpop.f32.mrb[15].mxu0  ;;  %v615_v47 = vmax.f32 %v315_v37, 0.0 }
  0xf9   :  { %v321_v46 = vadd.f32 %v320_v43, %v1739_v45  ;;  %v616_v49 = vmax.f32 %v317_v40, 0.0 }
  0xfa   :  { %v617_v48 = vmax.f32 %v319_v42, 0.0  ;;  %1321 = vmatmul.mubr.msk.bf16.gmra.mrb[120].mxu0 %vm153_vm0, %v115_v39 }
  0xfb   :  { %v618_v50 = vmax.f32 %v321_v46, 0.0  ;;  %592 = vmatprep.mubr.bf16.mxu0 %v1395_v1 }
  0xfc   :  { %v737_v53 = vpack.c.bf16 %v617_v48, %v615_v47 }
  0xfd   :  { %v324_v54 = vpop.f32.mrb[16].mxu0  ;;  %v738_v55 = vpack.c.bf16 %v618_v50, %v616_v49 }
  0xfe   :  { %v325_v56 = vadd.f32 %v324_v54, %v1737_v44  ;;  %v326_v57 = vpop.f32.mrb[17].mxu0 }
  0xff   :  { %v327_v59 = vadd.f32 %v326_v57, %v1739_v45  ;;  %v328_v60 = vpop.f32.mrb[18].mxu0  ;;  %986 = vmatprep.mubr.bf16.mxu1 %v738_v55 }
 0x100   :  { %v329_v1 = vadd.f32 %v328_v60, %v1737_v44  ;;  %v330_v61 = vpop.f32.mrb[19].mxu0  ;;  %987 = vmatmul.mubr.bf16.vlgmr.msra.gmra.mrb[0].mxu1 %v737_v53  ;;  %v619_v2 = vmax.f32 %v325_v56, 0.0 }
 0x101   :  { %v331_v62 = vadd.f32 %v330_v61, %v1739_v45  ;;  %v620_v4 = vmax.f32 %v327_v59, 0.0 }
 0x102   :  { %v621_v3 = vmax.f32 %v329_v1, 0.0  ;;  %1322 = vmatmul.mubr.msk.bf16.gmra.mrb[124].mxu0 %vm153_vm0, %v116_v58 }
 0x103   :  { %v622_v5 = vmax.f32 %v331_v62, 0.0  ;;  %962 = vmatprep.mubr.bf16.mxu0 %v1762_v0 }
 0x104   :  { %v739_v6 = vpack.c.bf16 %v621_v3, %v619_v2 }
 0x105   :  { %v740_v7 = vpack.c.bf16 %v622_v5, %v620_v4  ;;  %v334_v8 = vpop.f32.mrb[20].mxu0 }
 0x106   :  { %v335_v9 = vadd.f32 %v334_v8, %v1737_v44  ;;  %v336_v10 = vpop.f32.mrb[21].mxu0 }
 0x107   :  { %v337_v11 = vadd.f32 %v336_v10, %v1739_v45  ;;  %v338_v12 = vpop.f32.mrb[22].mxu0  ;;  %994 = vmatprep.mubr.bf16.mxu1 %v740_v7 }
 0x108   :  { %v339_v13 = vadd.f32 %v338_v12, %v1737_v44  ;;  %v340_v14 = vpop.f32.mrb[23].mxu0  ;;  %995 = vmatmul.mubr.bf16.gmra.mrb[4].mxu1 %v739_v6  ;;  %v623_v16 = vmax.f32 %v335_v9, 0.0 }
 0x109   :  { %v341_v15 = vadd.f32 %v340_v14, %v1739_v45  ;;  %v624_v0 = vmax.f32 %v337_v11, 0.0 }
 0x10a   :  { %v625_v19 = vmax.f32 %v339_v13, 0.0  ;;  %963 = vmatmul.mubr.bf16.vlgmr.msra.gmra.mrb[128].mxu0 %v1760_v63 }
 0x10b   :  { %v626_v20 = vmax.f32 %v341_v15, 0.0  ;;  %970 = vmatprep.mubr.bf16.mxu0 %v1778_v18 }
 0x10c   :  { %v741_v21 = vpack.c.bf16 %v625_v19, %v623_v16 }
 0x10d   :  { %v742_v22 = vpack.c.bf16 %v626_v20, %v624_v0  ;;  %v344_v23 = vpop.f32.mrb[24].mxu0 }
 0x10e   :  { %v345_v24 = vadd.f32 %v344_v23, %v1737_v44  ;;  %v346_v25 = vpop.f32.mrb[25].mxu0 }
 0x10f   :  { %v347_v26 = vadd.f32 %v346_v25, %v1739_v45  ;;  %v348_v27 = vpop.f32.mrb[26].mxu0  ;;  %1002 = vmatprep.mubr.bf16.mxu1 %v742_v22 }
 0x110   :  { %v349_v28 = vadd.f32 %v348_v27, %v1737_v44  ;;  %v350_v29 = vpop.f32.mrb[27].mxu0  ;;  %1003 = vmatmul.mubr.bf16.gmra.mrb[8].mxu1 %v741_v21  ;;  %v627_v30 = vmax.f32 %v345_v24, 0.0 }
 0x111   :  { %v351_v63 = vadd.f32 %v350_v29, %v1739_v45  ;;  %v628_v18 = vmax.f32 %v347_v26, 0.0 }
 0x112   :  { %v629_v31 = vmax.f32 %v349_v28, 0.0  ;;  %971 = vmatmul.mubr.bf16.gmra.mrb[132].mxu0 %v1776_v17 }
 0x113   :  { %v630_v32 = vmax.f32 %v351_v63, 0.0  ;;  %978 = vmatprep.mubr.bf16.mxu0 %v1794_v35 }
 0x114   :  { %v743_v33 = vpack.c.bf16 %v629_v31, %v627_v30 }
 0x115   :  { %v744_v36 = vpack.c.bf16 %v630_v32, %v628_v18  ;;  %v354_v37 = vpop.f32.mrb[28].mxu0 }
 0x116   :  { %v355_v38 = vadd.f32 %v354_v37, %v1737_v44  ;;  %v356_v39 = vpop.f32.mrb[29].mxu0 }
 0x117   :  { %v357_v40 = vadd.f32 %v356_v39, %v1739_v45  ;;  %v358_v41 = vpop.f32.mrb[30].mxu0  ;;  %1010 = vmatprep.mubr.bf16.mxu1 %v744_v36 }
 0x118   :  { %v359_v42 = vadd.f32 %v358_v41, %v1737_v44  ;;  %v360_v43 = vpop.f32.mrb[31].mxu0  ;;  %1011 = vmatmul.mubr.bf16.gmra.mrb[12].mxu1 %v743_v33  ;;  %v631_v46 = vmax.f32 %v355_v38, 0.0 }
 0x119   :  { %v361_v17 = vadd.f32 %v360_v43, %v1739_v45  ;;  %v632_v35 = vmax.f32 %v357_v40, 0.0 }
 0x11a   :  { %v633_v47 = vmax.f32 %v359_v42, 0.0  ;;  %979 = vmatmul.mubr.bf16.gmra.mrb[136].mxu0 %v1792_v34 }
 0x11b   :  { %v634_v48 = vmax.f32 %v361_v17, 0.0 }
 0x11c   :  { %v745_v49 = vpack.c.bf16 %v633_v47, %v631_v46 }
 0x11d   :  { %v746_v50 = vpack.c.bf16 %v634_v48, %v632_v35  ;;  %v364_v51 = vpop.f32.mrb[32].mxu0 }
 0x11e   :  { %v365_v52 = vadd.f32 %v364_v51, %v1737_v44  ;;  %v366_v53 = vpop.f32.mrb[33].mxu0 }
 0x11f   :  { %v367_v54 = vadd.f32 %v366_v53, %v1739_v45  ;;  %v368_v55 = vpop.f32.mrb[34].mxu0  ;;  %1018 = vmatprep.mubr.bf16.mxu1 %v746_v50 }
 0x120   :  { %v369_v56 = vadd.f32 %v368_v55, %v1737_v44  ;;  %v370_v57 = vpop.f32.mrb[35].mxu0  ;;  %1019 = vmatmul.mubr.bf16.gmra.mrb[16].mxu1 %v745_v49  ;;  %v635_v59 = vmax.f32 %v365_v52, 0.0 }
 0x121   :  { %v371_v58 = vadd.f32 %v370_v57, %v1739_v45  ;;  %v636_v60 = vmax.f32 %v367_v54, 0.0 }
 0x122   :  { %v637_v34 = vmax.f32 %v369_v56, 0.0 }
 0x123   :  { %v638_v1 = vmax.f32 %v371_v58, 0.0 }
 0x124   :  { %v747_v61 = vpack.c.bf16 %v637_v34, %v635_v59 }
 0x125   :  { %v748_v62 = vpack.c.bf16 %v638_v1, %v636_v60  ;;  %v374_v2 = vpop.f32.mrb[36].mxu0 }
 0x126   :  { %v375_v3 = vadd.f32 %v374_v2, %v1737_v44  ;;  %v376_v4 = vpop.f32.mrb[37].mxu0 }
 0x127   :  { %v377_v5 = vadd.f32 %v376_v4, %v1739_v45  ;;  %v378_v6 = vpop.f32.mrb[38].mxu0  ;;  %1026 = vmatprep.mubr.bf16.mxu1 %v748_v62 }
 0x128   :  { %v379_v7 = vadd.f32 %v378_v6, %v1737_v44  ;;  %v380_v8 = vpop.f32.mrb[39].mxu0  ;;  %1027 = vmatmul.mubr.bf16.gmra.mrb[20].mxu1 %v747_v61  ;;  %v639_v10 = vmax.f32 %v375_v3, 0.0 }
 0x129   :  { %v381_v9 = vadd.f32 %v380_v8, %v1739_v45  ;;  %v640_v12 = vmax.f32 %v377_v5, 0.0 }
 0x12a   :  { %v641_v11 = vmax.f32 %v379_v7, 0.0 }
 0x12b   :  { %v642_v13 = vmax.f32 %v381_v9, 0.0 }
 0x12c   :  { %v749_v14 = vpack.c.bf16 %v641_v11, %v639_v10 }
 0x12d   :  { %v750_v15 = vpack.c.bf16 %v642_v13, %v640_v12  ;;  %v384_v16 = vpop.f32.mrb[40].mxu0 }
 0x12e   :  { %v385_v19 = vadd.f32 %v384_v16, %v1737_v44  ;;  %v386_v0 = vpop.f32.mrb[41].mxu0 }
 0x12f   :  { %v387_v20 = vadd.f32 %v386_v0, %v1739_v45  ;;  %v388_v21 = vpop.f32.mrb[42].mxu0  ;;  %1034 = vmatprep.mubr.bf16.mxu1 %v750_v15 }
 0x130   :  { %v389_v22 = vadd.f32 %v388_v21, %v1737_v44  ;;  %v390_v23 = vpop.f32.mrb[43].mxu0  ;;  %1035 = vmatmul.mubr.bf16.gmra.mrb[24].mxu1 %v749_v14  ;;  %v643_v25 = vmax.f32 %v385_v19, 0.0 }
 0x131   :  { %v391_v24 = vadd.f32 %v390_v23, %v1739_v45  ;;  %v644_v27 = vmax.f32 %v387_v20, 0.0 }
 0x132   :  { %v645_v26 = vmax.f32 %v389_v22, 0.0 }
 0x133   :  { %v646_v28 = vmax.f32 %v391_v24, 0.0 }
 0x134   :  { %v751_v29 = vpack.c.bf16 %v645_v26, %v643_v25 }
 0x135   :  { %v752_v63 = vpack.c.bf16 %v646_v28, %v644_v27  ;;  %v394_v30 = vpop.f32.mrb[44].mxu0 }
 0x136   :  { %v395_v31 = vadd.f32 %v394_v30, %v1737_v44  ;;  %v396_v18 = vpop.f32.mrb[45].mxu0 }
 0x137   :  { %v397_v32 = vadd.f32 %v396_v18, %v1739_v45  ;;  %v398_v33 = vpop.f32.mrb[46].mxu0  ;;  %1042 = vmatprep.mubr.bf16.mxu1 %v752_v63 }
 0x138   :  { %v399_v36 = vadd.f32 %v398_v33, %v1737_v44  ;;  %v400_v37 = vpop.f32.mrb[47].mxu0  ;;  %1043 = vmatmul.mubr.bf16.gmra.mrb[28].mxu1 %v751_v29  ;;  %v647_v39 = vmax.f32 %v395_v31, 0.0 }
 0x139   :  { %v401_v38 = vadd.f32 %v400_v37, %v1739_v45  ;;  %v648_v41 = vmax.f32 %v397_v32, 0.0 }
 0x13a   :  { %v649_v40 = vmax.f32 %v399_v36, 0.0 }
 0x13b   :  { %v650_v42 = vmax.f32 %v401_v38, 0.0 }
 0x13c   :  { %v753_v43 = vpack.c.bf16 %v649_v40, %v647_v39 }
 0x13d   :  { %v754_v17 = vpack.c.bf16 %v650_v42, %v648_v41  ;;  %v404_v46 = vpop.f32.mrb[48].mxu0 }
 0x13e   :  { %v405_v47 = vadd.f32 %v404_v46, %v1737_v44  ;;  %v406_v35 = vpop.f32.mrb[49].mxu0 }
 0x13f   :  { %v407_v48 = vadd.f32 %v406_v35, %v1739_v45  ;;  %v408_v49 = vpop.f32.mrb[50].mxu0  ;;  %1050 = vmatprep.mubr.bf16.mxu1 %v754_v17 }
 0x140   :  { %v409_v50 = vadd.f32 %v408_v49, %v1737_v44  ;;  %v410_v51 = vpop.f32.mrb[51].mxu0  ;;  %1051 = vmatmul.mubr.bf16.gmra.mrb[32].mxu1 %v753_v43  ;;  %v651_v53 = vmax.f32 %v405_v47, 0.0 }
 0x141   :  { %v411_v52 = vadd.f32 %v410_v51, %v1739_v45  ;;  %v652_v55 = vmax.f32 %v407_v48, 0.0 }
 0x142   :  { %v653_v54 = vmax.f32 %v409_v50, 0.0 }
 0x143   :  { %v654_v56 = vmax.f32 %v411_v52, 0.0 }
 0x144   :  { %v755_v57 = vpack.c.bf16 %v653_v54, %v651_v53 }
 0x145   :  { %v756_v58 = vpack.c.bf16 %v654_v56, %v652_v55  ;;  %v414_v59 = vpop.f32.mrb[52].mxu0 }
 0x146   :  { %v415_v34 = vadd.f32 %v414_v59, %v1737_v44  ;;  %v416_v60 = vpop.f32.mrb[53].mxu0 }
 0x147   :  { %v417_v1 = vadd.f32 %v416_v60, %v1739_v45  ;;  %v418_v61 = vpop.f32.mrb[54].mxu0  ;;  %1058 = vmatprep.mubr.bf16.mxu1 %v756_v58 }
 0x148   :  { %v419_v62 = vadd.f32 %v418_v61, %v1737_v44  ;;  %v420_v2 = vpop.f32.mrb[55].mxu0  ;;  %1059 = vmatmul.mubr.bf16.gmra.mrb[36].mxu1 %v755_v57  ;;  %v655_v4 = vmax.f32 %v415_v34, 0.0 }
 0x149   :  { %v421_v3 = vadd.f32 %v420_v2, %v1739_v45  ;;  %v656_v6 = vmax.f32 %v417_v1, 0.0 }
 0x14a   :  { %v657_v5 = vmax.f32 %v419_v62, 0.0 }
 0x14b   :  { %v658_v7 = vmax.f32 %v421_v3, 0.0 }
 0x14c   :  { %v757_v8 = vpack.c.bf16 %v657_v5, %v655_v4 }
 0x14d   :  { %v758_v9 = vpack.c.bf16 %v658_v7, %v656_v6  ;;  %v424_v10 = vpop.f32.mrb[56].mxu0 }
 0x14e   :  { %v425_v11 = vadd.f32 %v424_v10, %v1737_v44  ;;  %v426_v12 = vpop.f32.mrb[57].mxu0 }
 0x14f   :  { %v427_v13 = vadd.f32 %v426_v12, %v1739_v45  ;;  %v428_v14 = vpop.f32.mrb[58].mxu0  ;;  %1066 = vmatprep.mubr.bf16.mxu1 %v758_v9 }
 0x150   :  { %v429_v15 = vadd.f32 %v428_v14, %v1737_v44  ;;  %v430_v16 = vpop.f32.mrb[59].mxu0  ;;  %1067 = vmatmul.mubr.bf16.gmra.mrb[40].mxu1 %v757_v8  ;;  %v659_v0 = vmax.f32 %v425_v11, 0.0 }
 0x151   :  { %v431_v19 = vadd.f32 %v430_v16, %v1739_v45  ;;  %v660_v21 = vmax.f32 %v427_v13, 0.0 }
 0x152   :  { %v661_v20 = vmax.f32 %v429_v15, 0.0 }
 0x153   :  { %v662_v22 = vmax.f32 %v431_v19, 0.0 }
 0x154   :  { %v759_v23 = vpack.c.bf16 %v661_v20, %v659_v0 }
 0x155   :  { %v760_v24 = vpack.c.bf16 %v662_v22, %v660_v21  ;;  %v434_v25 = vpop.f32.mrb[60].mxu0 }
 0x156   :  { %v435_v26 = vadd.f32 %v434_v25, %v1737_v44  ;;  %v436_v27 = vpop.f32.mrb[61].mxu0 }
 0x157   :  { %v437_v28 = vadd.f32 %v436_v27, %v1739_v45  ;;  %v438_v29 = vpop.f32.mrb[62].mxu0  ;;  %1074 = vmatprep.mubr.bf16.mxu1 %v760_v24 }
 0x158   :  { %v439_v63 = vadd.f32 %v438_v29, %v1737_v44  ;;  %v440_v30 = vpop.f32.mrb[63].mxu0  ;;  %1075 = vmatmul.mubr.bf16.gmra.mrb[44].mxu1 %v759_v23  ;;  %v663_v18 = vmax.f32 %v435_v26, 0.0 }
 0x159   :  { %v441_v31 = vadd.f32 %v440_v30, %v1739_v45  ;;  %v664_v33 = vmax.f32 %v437_v28, 0.0 }
 0x15a   :  { %v665_v32 = vmax.f32 %v439_v63, 0.0 }
 0x15b   :  { %v666_v36 = vmax.f32 %v441_v31, 0.0 }
 0x15c   :  { %v761_v37 = vpack.c.bf16 %v665_v32, %v663_v18 }
 0x15d   :  { %v762_v38 = vpack.c.bf16 %v666_v36, %v664_v33  ;;  %v444_v39 = vpop.f32.mrb[64].mxu0 }
 0x15e   :  { %v445_v40 = vadd.f32 %v444_v39, %v1737_v44  ;;  %v446_v41 = vpop.f32.mrb[65].mxu0 }
 0x15f   :  { %v447_v42 = vadd.f32 %v446_v41, %v1739_v45  ;;  %v448_v43 = vpop.f32.mrb[66].mxu0  ;;  %1082 = vmatprep.mubr.bf16.mxu1 %v762_v38 }
 0x160   :  { %v449_v17 = vadd.f32 %v448_v43, %v1737_v44  ;;  %v450_v46 = vpop.f32.mrb[67].mxu0  ;;  %1083 = vmatmul.mubr.bf16.gmra.mrb[48].mxu1 %v761_v37  ;;  %v667_v35 = vmax.f32 %v445_v40, 0.0 }
 0x161   :  { %v451_v47 = vadd.f32 %v450_v46, %v1739_v45  ;;  %v668_v49 = vmax.f32 %v447_v42, 0.0 }
 0x162   :  { %v669_v48 = vmax.f32 %v449_v17, 0.0 }
 0x163   :  { %v670_v50 = vmax.f32 %v451_v47, 0.0 }
 0x164   :  { %v763_v51 = vpack.c.bf16 %v669_v48, %v667_v35 }
 0x165   :  { %v764_v52 = vpack.c.bf16 %v670_v50, %v668_v49  ;;  %v454_v53 = vpop.f32.mrb[68].mxu0 }
 0x166   :  { %v455_v54 = vadd.f32 %v454_v53, %v1737_v44  ;;  %v456_v55 = vpop.f32.mrb[69].mxu0 }
 0x167   :  { %v457_v56 = vadd.f32 %v456_v55, %v1739_v45  ;;  %v458_v57 = vpop.f32.mrb[70].mxu0  ;;  %1090 = vmatprep.mubr.bf16.mxu1 %v764_v52 }
 0x168   :  { %v459_v58 = vadd.f32 %v458_v57, %v1737_v44  ;;  %v460_v59 = vpop.f32.mrb[71].mxu0  ;;  %1091 = vmatmul.mubr.bf16.gmra.mrb[52].mxu1 %v763_v51  ;;  %v671_v60 = vmax.f32 %v455_v54, 0.0 }
 0x169   :  { %v461_v34 = vadd.f32 %v460_v59, %v1739_v45  ;;  %v672_v61 = vmax.f32 %v457_v56, 0.0 }
 0x16a   :  { %v673_v1 = vmax.f32 %v459_v58, 0.0 }
 0x16b   :  { %v674_v62 = vmax.f32 %v461_v34, 0.0 }
 0x16c   :  { %v765_v2 = vpack.c.bf16 %v673_v1, %v671_v60 }
 0x16d   :  { %v766_v3 = vpack.c.bf16 %v674_v62, %v672_v61  ;;  %v464_v4 = vpop.f32.mrb[72].mxu0 }
 0x16e   :  { %v465_v5 = vadd.f32 %v464_v4, %v1737_v44  ;;  %v466_v6 = vpop.f32.mrb[73].mxu0 }
 0x16f   :  { %v467_v7 = vadd.f32 %v466_v6, %v1739_v45  ;;  %v468_v8 = vpop.f32.mrb[74].mxu0  ;;  %1098 = vmatprep.mubr.bf16.mxu1 %v766_v3 }
 0x170   :  { %v469_v9 = vadd.f32 %v468_v8, %v1737_v44  ;;  %v470_v10 = vpop.f32.mrb[75].mxu0  ;;  %1099 = vmatmul.mubr.bf16.gmra.mrb[56].mxu1 %v765_v2  ;;  %v675_v12 = vmax.f32 %v465_v5, 0.0 }
 0x171   :  { %v471_v11 = vadd.f32 %v470_v10, %v1739_v45  ;;  %v676_v14 = vmax.f32 %v467_v7, 0.0 }
 0x172   :  { %v677_v13 = vmax.f32 %v469_v9, 0.0 }
 0x173   :  { %v678_v15 = vmax.f32 %v471_v11, 0.0 }
 0x174   :  { %v767_v16 = vpack.c.bf16 %v677_v13, %v675_v12 }
 0x175   :  { %v768_v19 = vpack.c.bf16 %v678_v15, %v676_v14  ;;  %v474_v0 = vpop.f32.mrb[76].mxu0 }
 0x176   :  { %v475_v20 = vadd.f32 %v474_v0, %v1737_v44  ;;  %v476_v21 = vpop.f32.mrb[77].mxu0 }
 0x177   :  { %v477_v22 = vadd.f32 %v476_v21, %v1739_v45  ;;  %v478_v23 = vpop.f32.mrb[78].mxu0  ;;  %1106 = vmatprep.mubr.bf16.mxu1 %v768_v19 }
 0x178   :  { %v479_v24 = vadd.f32 %v478_v23, %v1737_v44  ;;  %v480_v25 = vpop.f32.mrb[79].mxu0  ;;  %1107 = vmatmul.mubr.bf16.gmra.mrb[60].mxu1 %v767_v16  ;;  %v679_v27 = vmax.f32 %v475_v20, 0.0 }
 0x179   :  { %v481_v26 = vadd.f32 %v480_v25, %v1739_v45  ;;  %v680_v29 = vmax.f32 %v477_v22, 0.0 }
 0x17a   :  { %v681_v28 = vmax.f32 %v479_v24, 0.0 }
 0x17b   :  { %v682_v63 = vmax.f32 %v481_v26, 0.0 }
 0x17c   :  { %v769_v30 = vpack.c.bf16 %v681_v28, %v679_v27 }
 0x17d   :  { %v770_v31 = vpack.c.bf16 %v682_v63, %v680_v29  ;;  %v484_v18 = vpop.f32.mrb[80].mxu0 }
 0x17e   :  { %v485_v32 = vadd.f32 %v484_v18, %v1737_v44  ;;  %v486_v33 = vpop.f32.mrb[81].mxu0 }
 0x17f   :  { %v487_v36 = vadd.f32 %v486_v33, %v1739_v45  ;;  %v488_v37 = vpop.f32.mrb[82].mxu0  ;;  %1114 = vmatprep.mubr.bf16.mxu1 %v770_v31 }
 0x180   :  { %v489_v38 = vadd.f32 %v488_v37, %v1737_v44  ;;  %v490_v39 = vpop.f32.mrb[83].mxu0  ;;  %1115 = vmatmul.mubr.bf16.gmra.mrb[64].mxu1 %v769_v30  ;;  %v683_v41 = vmax.f32 %v485_v32, 0.0 }
 0x181   :  { %v491_v40 = vadd.f32 %v490_v39, %v1739_v45  ;;  %v684_v43 = vmax.f32 %v487_v36, 0.0 }
 0x182   :  { %v685_v42 = vmax.f32 %v489_v38, 0.0 }
 0x183   :  { %v686_v17 = vmax.f32 %v491_v40, 0.0 }
 0x184   :  { %v771_v46 = vpack.c.bf16 %v685_v42, %v683_v41 }
 0x185   :  { %v772_v47 = vpack.c.bf16 %v686_v17, %v684_v43  ;;  %v494_v35 = vpop.f32.mrb[84].mxu0 }
 0x186   :  { %v495_v48 = vadd.f32 %v494_v35, %v1737_v44  ;;  %v496_v49 = vpop.f32.mrb[85].mxu0 }
 0x187   :  { %v497_v50 = vadd.f32 %v496_v49, %v1739_v45  ;;  %v498_v51 = vpop.f32.mrb[86].mxu0  ;;  %1122 = vmatprep.mubr.bf16.mxu1 %v772_v47 }
 0x188   :  { %v499_v52 = vadd.f32 %v498_v51, %v1737_v44  ;;  %v500_v53 = vpop.f32.mrb[87].mxu0  ;;  %1123 = vmatmul.mubr.bf16.gmra.mrb[68].mxu1 %v771_v46  ;;  %v687_v55 = vmax.f32 %v495_v48, 0.0 }
 0x189   :  { %v501_v54 = vadd.f32 %v500_v53, %v1739_v45  ;;  %v688_v57 = vmax.f32 %v497_v50, 0.0 }
 0x18a   :  { %v689_v56 = vmax.f32 %v499_v52, 0.0 }
 0x18b   :  { %v690_v58 = vmax.f32 %v501_v54, 0.0 }
 0x18c   :  { %v773_v59 = vpack.c.bf16 %v689_v56, %v687_v55 }
 0x18d   :  { %v774_v34 = vpack.c.bf16 %v690_v58, %v688_v57  ;;  %v504_v60 = vpop.f32.mrb[88].mxu0 }
 0x18e   :  { %v505_v1 = vadd.f32 %v504_v60, %v1737_v44  ;;  %v506_v61 = vpop.f32.mrb[89].mxu0 }
 0x18f   :  { %v507_v62 = vadd.f32 %v506_v61, %v1739_v45  ;;  %v508_v2 = vpop.f32.mrb[90].mxu0  ;;  %1130 = vmatprep.mubr.bf16.mxu1 %v774_v34 }
 0x190   :  { %v509_v3 = vadd.f32 %v508_v2, %v1737_v44  ;;  %v510_v4 = vpop.f32.mrb[91].mxu0  ;;  %1131 = vmatmul.mubr.bf16.gmra.mrb[72].mxu1 %v773_v59  ;;  %v691_v6 = vmax.f32 %v505_v1, 0.0 }
 0x191   :  { %v511_v5 = vadd.f32 %v510_v4, %v1739_v45  ;;  %v692_v8 = vmax.f32 %v507_v62, 0.0 }
 0x192   :  { %v693_v7 = vmax.f32 %v509_v3, 0.0 }
 0x193   :  { %v694_v9 = vmax.f32 %v511_v5, 0.0 }
 0x194   :  { %v775_v10 = vpack.c.bf16 %v693_v7, %v691_v6 }
 0x195   :  { %v776_v11 = vpack.c.bf16 %v694_v9, %v692_v8  ;;  %v514_v12 = vpop.f32.mrb[92].mxu0 }
 0x196   :  { %v515_v13 = vadd.f32 %v514_v12, %v1737_v44  ;;  %v516_v14 = vpop.f32.mrb[93].mxu0 }
 0x197   :  { %v517_v15 = vadd.f32 %v516_v14, %v1739_v45  ;;  %v518_v16 = vpop.f32.mrb[94].mxu0  ;;  %1138 = vmatprep.mubr.bf16.mxu1 %v776_v11 }
 0x198   :  { %v519_v19 = vadd.f32 %v518_v16, %v1737_v44  ;;  %v520_v0 = vpop.f32.mrb[95].mxu0  ;;  %1139 = vmatmul.mubr.bf16.gmra.mrb[76].mxu1 %v775_v10  ;;  %v695_v21 = vmax.f32 %v515_v13, 0.0 }
 0x199   :  { %v521_v20 = vadd.f32 %v520_v0, %v1739_v45  ;;  %v696_v23 = vmax.f32 %v517_v15, 0.0 }
 0x19a   :  { %v697_v22 = vmax.f32 %v519_v19, 0.0 }
 0x19b   :  { %v698_v24 = vmax.f32 %v521_v20, 0.0 }
 0x19c   :  { %v777_v25 = vpack.c.bf16 %v697_v22, %v695_v21 }
 0x19d   :  { %v778_v26 = vpack.c.bf16 %v698_v24, %v696_v23  ;;  %v524_v27 = vpop.f32.mrb[96].mxu0 }
 0x19e   :  { %v525_v28 = vadd.f32 %v524_v27, %v1737_v44  ;;  %v526_v29 = vpop.f32.mrb[97].mxu0 }
 0x19f   :  { %v527_v63 = vadd.f32 %v526_v29, %v1739_v45  ;;  %v528_v30 = vpop.f32.mrb[98].mxu0  ;;  %1146 = vmatprep.mubr.bf16.mxu1 %v778_v26 }
 0x1a0   :  { %v529_v31 = vadd.f32 %v528_v30, %v1737_v44  ;;  %v530_v18 = vpop.f32.mrb[99].mxu0  ;;  %1147 = vmatmul.mubr.bf16.gmra.mrb[80].mxu1 %v777_v25  ;;  %v699_v33 = vmax.f32 %v525_v28, 0.0 }
 0x1a1   :  { %v531_v32 = vadd.f32 %v530_v18, %v1739_v45  ;;  %v700_v37 = vmax.f32 %v527_v63, 0.0 }
 0x1a2   :  { %v701_v36 = vmax.f32 %v529_v31, 0.0 }
 0x1a3   :  { %v702_v38 = vmax.f32 %v531_v32, 0.0 }
 0x1a4   :  { %v779_v39 = vpack.c.bf16 %v701_v36, %v699_v33 }
 0x1a5   :  { %v780_v40 = vpack.c.bf16 %v702_v38, %v700_v37  ;;  %v534_v41 = vpop.f32.mrb[100].mxu0 }
 0x1a6   :  { %v535_v42 = vadd.f32 %v534_v41, %v1737_v44  ;;  %v536_v43 = vpop.f32.mrb[101].mxu0 }
 0x1a7   :  { %v537_v17 = vadd.f32 %v536_v43, %v1739_v45  ;;  %v538_v46 = vpop.f32.mrb[102].mxu0  ;;  %1154 = vmatprep.mubr.bf16.mxu1 %v780_v40 }
 0x1a8   :  { %v539_v47 = vadd.f32 %v538_v46, %v1737_v44  ;;  %v540_v35 = vpop.f32.mrb[103].mxu0  ;;  %1155 = vmatmul.mubr.bf16.gmra.mrb[84].mxu1 %v779_v39  ;;  %v703_v49 = vmax.f32 %v535_v42, 0.0 }
 0x1a9   :  { %v541_v48 = vadd.f32 %v540_v35, %v1739_v45  ;;  %v704_v51 = vmax.f32 %v537_v17, 0.0 }
 0x1aa   :  { %v705_v50 = vmax.f32 %v539_v47, 0.0 }
 0x1ab   :  { %v706_v52 = vmax.f32 %v541_v48, 0.0 }
 0x1ac   :  { %v781_v53 = vpack.c.bf16 %v705_v50, %v703_v49 }
 0x1ad   :  { %v782_v54 = vpack.c.bf16 %v706_v52, %v704_v51  ;;  %v544_v55 = vpop.f32.mrb[104].mxu0 }
 0x1ae   :  { %v545_v56 = vadd.f32 %v544_v55, %v1737_v44  ;;  %v546_v57 = vpop.f32.mrb[105].mxu0 }
 0x1af   :  { %v547_v58 = vadd.f32 %v546_v57, %v1739_v45  ;;  %v548_v59 = vpop.f32.mrb[106].mxu0  ;;  %1162 = vmatprep.mubr.bf16.mxu1 %v782_v54  ;;  %v1926_v57 = vld [vmem:[%s2192_s4] ss:$0 sm:$0xff] }
 0x1b0   :  { %v549_v34 = vadd.f32 %v548_v59, %v1737_v44  ;;  %v550_v60 = vpop.f32.mrb[107].mxu0  ;;  %1163 = vmatmul.mubr.bf16.gmra.mrb[88].mxu1 %v781_v53  ;;  %v707_v61 = vmax.f32 %v545_v56, 0.0 }
 0x1b1   :  { %v551_v1 = vadd.f32 %v550_v60, %v1739_v45  ;;  %v708_v2 = vmax.f32 %v547_v58, 0.0 }
 0x1b2   :  { %v709_v62 = vmax.f32 %v549_v34, 0.0 }
 0x1b3   :  { %v710_v3 = vmax.f32 %v551_v1, 0.0 }
 0x1b4   :  { %v783_v4 = vpack.c.bf16 %v709_v62, %v707_v61 }
 0x1b5   :  { %v784_v5 = vpack.c.bf16 %v710_v3, %v708_v2  ;;  %v554_v6 = vpop.f32.mrb[108].mxu0 }
 0x1b6   :  { %v555_v7 = vadd.f32 %v554_v6, %v1737_v44  ;;  %v556_v8 = vpop.f32.mrb[109].mxu0 }
 0x1b7   :  { %v557_v9 = vadd.f32 %v556_v8, %v1739_v45  ;;  %v558_v10 = vpop.f32.mrb[110].mxu0  ;;  %1170 = vmatprep.mubr.bf16.mxu1 %v784_v5 }
 0x1b8   :  { %v559_v11 = vadd.f32 %v558_v10, %v1737_v44  ;;  %v560_v12 = vpop.f32.mrb[111].mxu0  ;;  %1171 = vmatmul.mubr.bf16.gmra.mrb[92].mxu1 %v783_v4  ;;  %v711_v14 = vmax.f32 %v555_v7, 0.0 }
 0x1b9   :  { %v561_v13 = vadd.f32 %v560_v12, %v1739_v45  ;;  %v712_v16 = vmax.f32 %v557_v9, 0.0 }
 0x1ba   :  { %v713_v15 = vmax.f32 %v559_v11, 0.0 }
 0x1bb   :  { %v714_v19 = vmax.f32 %v561_v13, 0.0 }
 0x1bc   :  { %v785_v0 = vpack.c.bf16 %v713_v15, %v711_v14 }
 0x1bd   :  { %v786_v20 = vpack.c.bf16 %v714_v19, %v712_v16  ;;  %v564_v21 = vpop.f32.mrb[112].mxu0 }
 0x1be   :  { %v565_v22 = vadd.f32 %v564_v21, %v1737_v44  ;;  %v566_v23 = vpop.f32.mrb[113].mxu0 }
 0x1bf   :  { %v567_v24 = vadd.f32 %v566_v23, %v1739_v45  ;;  %v568_v25 = vpop.f32.mrb[114].mxu0  ;;  %1178 = vmatprep.mubr.bf16.mxu1 %v786_v20 }
 0x1c0   :  { %v569_v26 = vadd.f32 %v568_v25, %v1737_v44  ;;  %v570_v27 = vpop.f32.mrb[115].mxu0  ;;  %1179 = vmatmul.mubr.bf16.gmra.mrb[96].mxu1 %v785_v0  ;;  %v715_v29 = vmax.f32 %v565_v22, 0.0 }
 0x1c1   :  { %v571_v28 = vadd.f32 %v570_v27, %v1739_v45  ;;  %v716_v30 = vmax.f32 %v567_v24, 0.0 }
 0x1c2   :  { %v717_v63 = vmax.f32 %v569_v26, 0.0 }
 0x1c3   :  { %v718_v31 = vmax.f32 %v571_v28, 0.0 }
 0x1c4   :  { %v787_v18 = vpack.c.bf16 %v717_v63, %v715_v29 }
 0x1c5   :  { %v788_v32 = vpack.c.bf16 %v718_v31, %v716_v30  ;;  %v574_v33 = vpop.f32.mrb[116].mxu0 }
 0x1c6   :  { %v575_v36 = vadd.f32 %v574_v33, %v1737_v44  ;;  %v576_v37 = vpop.f32.mrb[117].mxu0 }
 0x1c7   :  { %v577_v38 = vadd.f32 %v576_v37, %v1739_v45  ;;  %v578_v39 = vpop.f32.mrb[118].mxu0  ;;  %1186 = vmatprep.mubr.bf16.mxu1 %v788_v32 }
 0x1c8   :  { %v579_v40 = vadd.f32 %v578_v39, %v1737_v44  ;;  %v580_v41 = vpop.f32.mrb[119].mxu0  ;;  %1187 = vmatmul.mubr.bf16.gmra.mrb[100].mxu1 %v787_v18  ;;  %v719_v43 = vmax.f32 %v575_v36, 0.0 }
 0x1c9   :  { %v581_v42 = vadd.f32 %v580_v41, %v1739_v45  ;;  %v720_v46 = vmax.f32 %v577_v38, 0.0 }
 0x1ca   :  { %v721_v17 = vmax.f32 %v579_v40, 0.0 }
 0x1cb   :  { %v722_v47 = vmax.f32 %v581_v42, 0.0 }
 0x1cc   :  { %v789_v35 = vpack.c.bf16 %v721_v17, %v719_v43 }
 0x1cd   :  { %v790_v48 = vpack.c.bf16 %v722_v47, %v720_v46  ;;  %v584_v49 = vpop.f32.mrb[120].mxu0 }
 0x1ce   :  { %v585_v50 = vadd.f32 %v584_v49, %v1737_v44  ;;  %v586_v51 = vpop.f32.mrb[121].mxu0 }
 0x1cf   :  { %v587_v52 = vadd.f32 %v586_v51, %v1739_v45  ;;  %v588_v53 = vpop.f32.mrb[122].mxu0  ;;  %1194 = vmatprep.mubr.bf16.mxu1 %v790_v48 }
 0x1d0   :  { %v589_v54 = vadd.f32 %v588_v53, %v1737_v44  ;;  %v590_v55 = vpop.f32.mrb[123].mxu0  ;;  %1195 = vmatmul.mubr.bf16.gmra.mrb[104].mxu1 %v789_v35  ;;  %v723_v58 = vmax.f32 %v585_v50, 0.0 }
 0x1d1   :  { %v591_v56 = vadd.f32 %v590_v55, %v1739_v45  ;;  %v724_v34 = vmax.f32 %v587_v52, 0.0 }
 0x1d2   :  { %v725_v59 = vmax.f32 %v589_v54, 0.0 }
 0x1d3   :  { %v726_v60 = vmax.f32 %v591_v56, 0.0  ;;  %v988_v1 = vpop.f32.mrb[0].mxu1 }
 0x1d4   :  { %v791_v61 = vpack.c.bf16 %v725_v59, %v723_v58  ;;  %v989_v62 = vadd.f32 %v1926_v57, %v988_v1  ;;  %v990_v2 = vpop.f32.mrb[1].mxu1 }
 0x1d5   :  { %v792_v3 = vpack.c.bf16 %v726_v60, %v724_v34  ;;  %v594_v4 = vpop.f32.mrb[124].mxu0  ;;  %v991_v5 = vpop.f32.mrb[2].mxu1 }
 0x1d6   :  { %1225 = vst [vmem:[%s2193_s5 + $0x30] sm:$0xff] %v989_v62  ;;  %v595_v6 = vadd.f32 %v594_v4, %v1737_v44  ;;  %v992_v7 = vadd.f32 %v1926_v57, %v991_v5  ;;  %v596_v8 = vpop.f32.mrb[125].mxu0  ;;  %v993_v9 = vpop.f32.mrb[3].mxu1 }
 0x1d7   :  { %v597_v10 = vadd.f32 %v596_v8, %v1739_v45  ;;  %v598_v11 = vpop.f32.mrb[126].mxu0  ;;  %1202 = vmatprep.mubr.bf16.mxu1 %v792_v3 }
 0x1d8   :  { %1226 = vst [vmem:[%s2193_s5 + $0x38] sm:$0xff] %v992_v7  ;;  %v599_v12 = vadd.f32 %v598_v11, %v1737_v44  ;;  %v600_v13 = vpop.f32.mrb[127].mxu0  ;;  %1203 = vmatmul.mubr.bf16.gmra.mrb[108].mxu1 %v791_v61  ;;  %v727_v15 = vmax.f32 %v595_v6, 0.0 }
 0x1d9   :  { %v601_v14 = vadd.f32 %v600_v13, %v1739_v45  ;;  %v728_v19 = vmax.f32 %v597_v10, 0.0 }
 0x1da   :  { %v729_v16 = vmax.f32 %v599_v12, 0.0 }
 0x1db   :  { %v730_v0 = vmax.f32 %v601_v14, 0.0  ;;  %v996_v20 = vpop.f32.mrb[4].mxu1 }
 0x1dc   :  { %v793_v21 = vpack.c.bf16 %v729_v16, %v727_v15  ;;  %v997_v22 = vadd.f32 %v1926_v57, %v996_v20  ;;  %v998_v23 = vpop.f32.mrb[5].mxu1 }
 0x1dd   :  { %v794_v24 = vpack.c.bf16 %v730_v0, %v728_v19  ;;  %v964_v25 = vpop.f32.mrb[128].mxu0  ;;  %v999_v26 = vpop.f32.mrb[6].mxu1 }
 0x1de   :  { %1227 = vst [vmem:[%s2193_s5 + $0x40] sm:$0xff] %v997_v22  ;;  %v965_v44 = vadd.f32 %v1926_v57, %v964_v25  ;;  %v1000_v45 = vadd.f32 %v1926_v57, %v999_v26  ;;  %v966_v27 = vpop.f32.mrb[129].mxu0  ;;  %v1001_v28 = vpop.f32.mrb[7].mxu1 }
 0x1df   :  { %v967_v29 = vpop.f32.mrb[130].mxu0  ;;  %1210 = vmatprep.mubr.bf16.mxu1 %v794_v24 }
 0x1e0   :  { %1219 = vst [vmem:[%s2193_s5] sm:$0xff] %v965_v44  ;;  %1228 = vst [vmem:[%s2193_s5 + $0x48] sm:$0xff] %v1000_v45  ;;  %v968_v63 = vadd.f32 %v1926_v57, %v967_v29  ;;  %v969_v30 = vpop.f32.mrb[131].mxu0  ;;  %1211 = vmatmul.mubr.bf16.gmra.mrb[112].mxu1 %v793_v21 }
 0x1e2   :  { %1220 = vst [vmem:[%s2193_s5 + $0x8] sm:$0xff] %v968_v63 }
 0x1e3   :  { %v1004_v31 = vpop.f32.mrb[8].mxu1 }
 0x1e4   :  { %v1005_v18 = vadd.f32 %v1926_v57, %v1004_v31  ;;  %v1006_v32 = vpop.f32.mrb[9].mxu1 }
 0x1e5   :  { %v972_v33 = vpop.f32.mrb[132].mxu0  ;;  %v1007_v36 = vpop.f32.mrb[10].mxu1 }
 0x1e6   :  { %1229 = vst [vmem:[%s2193_s5 + $0x50] sm:$0xff] %v1005_v18  ;;  %v973_v37 = vadd.f32 %v1926_v57, %v972_v33  ;;  %v1008_v38 = vadd.f32 %v1926_v57, %v1007_v36  ;;  %v974_v39 = vpop.f32.mrb[133].mxu0  ;;  %v1009_v40 = vpop.f32.mrb[11].mxu1 }
 0x1e7   :  { %v975_v41 = vpop.f32.mrb[134].mxu0 }
 0x1e8   :  { %1221 = vst [vmem:[%s2193_s5 + $0x10] sm:$0xff] %v973_v37  ;;  %1230 = vst [vmem:[%s2193_s5 + $0x58] sm:$0xff] %v1008_v38  ;;  %v976_v42 = vadd.f32 %v1926_v57, %v975_v41  ;;  %v977_v43 = vpop.f32.mrb[135].mxu0 }
 0x1ea   :  { %1222 = vst [vmem:[%s2193_s5 + $0x18] sm:$0xff] %v976_v42 }
 0x1eb   :  { %v1012_v17 = vpop.f32.mrb[12].mxu1 }
 0x1ec   :  { %v1013_v46 = vadd.f32 %v1926_v57, %v1012_v17  ;;  %v1014_v47 = vpop.f32.mrb[13].mxu1 }
 0x1ed   :  { %v980_v35 = vpop.f32.mrb[136].mxu0  ;;  %v1015_v48 = vpop.f32.mrb[14].mxu1 }
 0x1ee   :  { %1231 = vst [vmem:[%s2193_s5 + $0x60] sm:$0xff] %v1013_v46  ;;  %v981_v49 = vadd.f32 %v1926_v57, %v980_v35  ;;  %v1016_v50 = vadd.f32 %v1926_v57, %v1015_v48  ;;  %v982_v51 = vpop.f32.mrb[137].mxu0  ;;  %v1017_v52 = vpop.f32.mrb[15].mxu1 }
 0x1ef   :  { %v983_v53 = vpop.f32.mrb[138].mxu0 }
 0x1f0   :  { %1223 = vst [vmem:[%s2193_s5 + $0x20] sm:$0xff] %v981_v49  ;;  %1232 = vst [vmem:[%s2193_s5 + $0x68] sm:$0xff] %v1016_v50  ;;  %v984_v54 = vadd.f32 %v1926_v57, %v983_v53  ;;  %v985_v55 = vpop.f32.mrb[139].mxu0 }
 0x1f2   :  { %1224 = vst [vmem:[%s2193_s5 + $0x28] sm:$0xff] %v984_v54 }
 0x1f3   :  { %v1020_v56 = vpop.f32.mrb[16].mxu1 }
 0x1f4   :  { %v1021_v58 = vadd.f32 %v1926_v57, %v1020_v56  ;;  %v1022_v59 = vpop.f32.mrb[17].mxu1 }
 0x1f5   :  { %v1023_v34 = vpop.f32.mrb[18].mxu1 }
 0x1f6   :  { %1233 = vst [vmem:[%s2193_s5 + $0x70] sm:$0xff] %v1021_v58  ;;  %v1024_v60 = vadd.f32 %v1926_v57, %v1023_v34  ;;  %v1025_v1 = vpop.f32.mrb[19].mxu1 }
 0x1f8   :  { %1234 = vst [vmem:[%s2193_s5 + $0x78] sm:$0xff] %v1024_v60 }
 0x1fb   :  { %v1028_v61 = vpop.f32.mrb[20].mxu1 }
 0x1fc   :  { %v1029_v62 = vadd.f32 %v1926_v57, %v1028_v61  ;;  %v1030_v2 = vpop.f32.mrb[21].mxu1 }
 0x1fd   :  { %v1031_v3 = vpop.f32.mrb[22].mxu1 }
 0x1fe   :  { %1235 = vst [vmem:[%s2193_s5 + $0x80] sm:$0xff] %v1029_v62  ;;  %v1032_v4 = vadd.f32 %v1926_v57, %v1031_v3  ;;  %v1033_v5 = vpop.f32.mrb[23].mxu1 }
 0x200   :  { %1236 = vst [vmem:[%s2193_s5 + $0x88] sm:$0xff] %v1032_v4 }
 0x203   :  { %v1036_v6 = vpop.f32.mrb[24].mxu1 }
 0x204   :  { %v1037_v7 = vadd.f32 %v1926_v57, %v1036_v6  ;;  %v1038_v8 = vpop.f32.mrb[25].mxu1 }
 0x205   :  { %v1039_v9 = vpop.f32.mrb[26].mxu1 }
 0x206   :  { %1237 = vst [vmem:[%s2193_s5 + $0x90] sm:$0xff] %v1037_v7  ;;  %v1040_v10 = vadd.f32 %v1926_v57, %v1039_v9  ;;  %v1041_v11 = vpop.f32.mrb[27].mxu1 }
 0x208   :  { %1238 = vst [vmem:[%s2193_s5 + $0x98] sm:$0xff] %v1040_v10 }
 0x20b   :  { %v1044_v12 = vpop.f32.mrb[28].mxu1 }
 0x20c   :  { %v1045_v13 = vadd.f32 %v1926_v57, %v1044_v12  ;;  %v1046_v14 = vpop.f32.mrb[29].mxu1 }
 0x20d   :  { %v1047_v15 = vpop.f32.mrb[30].mxu1 }
 0x20e   :  { %1239 = vst [vmem:[%s2193_s5 + $0xa0] sm:$0xff] %v1045_v13  ;;  %v1048_v16 = vadd.f32 %v1926_v57, %v1047_v15  ;;  %v1049_v19 = vpop.f32.mrb[31].mxu1 }
 0x210   :  { %1240 = vst [vmem:[%s2193_s5 + $0xa8] sm:$0xff] %v1048_v16 }
 0x213   :  { %v1052_v0 = vpop.f32.mrb[32].mxu1 }
 0x214   :  { %v1053_v20 = vadd.f32 %v1926_v57, %v1052_v0  ;;  %v1054_v21 = vpop.f32.mrb[33].mxu1 }
 0x215   :  { %v1055_v22 = vpop.f32.mrb[34].mxu1 }
 0x216   :  { %1241 = vst [vmem:[%s2193_s5 + $0xb0] sm:$0xff] %v1053_v20  ;;  %v1056_v23 = vadd.f32 %v1926_v57, %v1055_v22  ;;  %v1057_v24 = vpop.f32.mrb[35].mxu1 }
 0x218   :  { %1242 = vst [vmem:[%s2193_s5 + $0xb8] sm:$0xff] %v1056_v23 }
 0x21b   :  { %v1060_v25 = vpop.f32.mrb[36].mxu1 }
 0x21c   :  { %v1061_v26 = vadd.f32 %v1926_v57, %v1060_v25  ;;  %v1062_v44 = vpop.f32.mrb[37].mxu1 }
 0x21d   :  { %v1063_v45 = vpop.f32.mrb[38].mxu1 }
 0x21e   :  { %1243 = vst [vmem:[%s2193_s5 + $0xc0] sm:$0xff] %v1061_v26  ;;  %v1064_v27 = vadd.f32 %v1926_v57, %v1063_v45  ;;  %v1065_v28 = vpop.f32.mrb[39].mxu1 }
 0x220   :  { %1244 = vst [vmem:[%s2193_s5 + $0xc8] sm:$0xff] %v1064_v27 }
 0x223   :  { %v1068_v29 = vpop.f32.mrb[40].mxu1 }
 0x224   :  { %v1069_v63 = vadd.f32 %v1926_v57, %v1068_v29  ;;  %v1070_v30 = vpop.f32.mrb[41].mxu1 }
 0x225   :  { %v1071_v31 = vpop.f32.mrb[42].mxu1 }
 0x226   :  { %1245 = vst [vmem:[%s2193_s5 + $0xd0] sm:$0xff] %v1069_v63  ;;  %v1072_v18 = vadd.f32 %v1926_v57, %v1071_v31  ;;  %v1073_v32 = vpop.f32.mrb[43].mxu1 }
 0x228   :  { %1246 = vst [vmem:[%s2193_s5 + $0xd8] sm:$0xff] %v1072_v18 }
 0x22b   :  { %v1076_v33 = vpop.f32.mrb[44].mxu1 }
 0x22c   :  { %v1077_v36 = vadd.f32 %v1926_v57, %v1076_v33  ;;  %v1078_v37 = vpop.f32.mrb[45].mxu1 }
 0x22d   :  { %v1079_v38 = vpop.f32.mrb[46].mxu1 }
 0x22e   :  { %1247 = vst [vmem:[%s2193_s5 + $0xe0] sm:$0xff] %v1077_v36  ;;  %v1080_v39 = vadd.f32 %v1926_v57, %v1079_v38  ;;  %v1081_v40 = vpop.f32.mrb[47].mxu1 }
 0x230   :  { %1248 = vst [vmem:[%s2193_s5 + $0xe8] sm:$0xff] %v1080_v39 }
 0x233   :  { %v1084_v41 = vpop.f32.mrb[48].mxu1 }
 0x234   :  { %v1085_v42 = vadd.f32 %v1926_v57, %v1084_v41  ;;  %v1086_v43 = vpop.f32.mrb[49].mxu1 }
 0x235   :  { %v1087_v17 = vpop.f32.mrb[50].mxu1 }
 0x236   :  { %1249 = vst [vmem:[%s2193_s5 + $0xf0] sm:$0xff] %v1085_v42  ;;  %v1088_v46 = vadd.f32 %v1926_v57, %v1087_v17  ;;  %v1089_v47 = vpop.f32.mrb[51].mxu1 }
 0x238   :  { %1250 = vst [vmem:[%s2193_s5 + $0xf8] sm:$0xff] %v1088_v46 }
 0x23b   :  { %v1092_v35 = vpop.f32.mrb[52].mxu1 }
 0x23c   :  { %v1093_v48 = vadd.f32 %v1926_v57, %v1092_v35  ;;  %v1094_v49 = vpop.f32.mrb[53].mxu1 }
 0x23d   :  { %v1095_v50 = vpop.f32.mrb[54].mxu1 }
 0x23e   :  { %1251 = vst [vmem:[%s2193_s5 + $0x100] sm:$0xff] %v1093_v48  ;;  %v1096_v51 = vadd.f32 %v1926_v57, %v1095_v50  ;;  %v1097_v52 = vpop.f32.mrb[55].mxu1 }
 0x240   :  { %1252 = vst [vmem:[%s2193_s5 + $0x108] sm:$0xff] %v1096_v51 }
 0x243   :  { %v1100_v53 = vpop.f32.mrb[56].mxu1 }
 0x244   :  { %v1101_v54 = vadd.f32 %v1926_v57, %v1100_v53  ;;  %v1102_v55 = vpop.f32.mrb[57].mxu1 }
 0x245   :  { %v1103_v56 = vpop.f32.mrb[58].mxu1 }
 0x246   :  { %1253 = vst [vmem:[%s2193_s5 + $0x110] sm:$0xff] %v1101_v54  ;;  %v1104_v58 = vadd.f32 %v1926_v57, %v1103_v56  ;;  %v1105_v59 = vpop.f32.mrb[59].mxu1 }
 0x248   :  { %1254 = vst [vmem:[%s2193_s5 + $0x118] sm:$0xff] %v1104_v58 }
 0x24b   :  { %v1108_v34 = vpop.f32.mrb[60].mxu1 }
 0x24c   :  { %v1109_v60 = vadd.f32 %v1926_v57, %v1108_v34  ;;  %v1110_v1 = vpop.f32.mrb[61].mxu1 }
 0x24d   :  { %v1111_v61 = vpop.f32.mrb[62].mxu1 }
 0x24e   :  { %1255 = vst [vmem:[%s2193_s5 + $0x120] sm:$0xff] %v1109_v60  ;;  %v1112_v62 = vadd.f32 %v1926_v57, %v1111_v61  ;;  %v1113_v2 = vpop.f32.mrb[63].mxu1 }
 0x250   :  { %1256 = vst [vmem:[%s2193_s5 + $0x128] sm:$0xff] %v1112_v62 }
 0x253   :  { %v1116_v3 = vpop.f32.mrb[64].mxu1 }
 0x254   :  { %v1117_v4 = vadd.f32 %v1926_v57, %v1116_v3  ;;  %v1118_v5 = vpop.f32.mrb[65].mxu1 }
 0x255   :  { %v1119_v6 = vpop.f32.mrb[66].mxu1 }
 0x256   :  { %1257 = vst [vmem:[%s2193_s5 + $0x130] sm:$0xff] %v1117_v4  ;;  %v1120_v7 = vadd.f32 %v1926_v57, %v1119_v6  ;;  %v1121_v8 = vpop.f32.mrb[67].mxu1 }
 0x258   :  { %1258 = vst [vmem:[%s2193_s5 + $0x138] sm:$0xff] %v1120_v7 }
 0x25b   :  { %v1124_v9 = vpop.f32.mrb[68].mxu1 }
 0x25c   :  { %v1125_v10 = vadd.f32 %v1926_v57, %v1124_v9  ;;  %v1126_v11 = vpop.f32.mrb[69].mxu1 }
 0x25d   :  { %v1127_v12 = vpop.f32.mrb[70].mxu1 }
 0x25e   :  { %1259 = vst [vmem:[%s2193_s5 + $0x140] sm:$0xff] %v1125_v10  ;;  %v1128_v13 = vadd.f32 %v1926_v57, %v1127_v12  ;;  %v1129_v14 = vpop.f32.mrb[71].mxu1 }
 0x260   :  { %1260 = vst [vmem:[%s2193_s5 + $0x148] sm:$0xff] %v1128_v13 }
 0x263   :  { %v1132_v15 = vpop.f32.mrb[72].mxu1 }
 0x264   :  { %v1133_v16 = vadd.f32 %v1926_v57, %v1132_v15  ;;  %v1134_v19 = vpop.f32.mrb[73].mxu1 }
 0x265   :  { %v1135_v0 = vpop.f32.mrb[74].mxu1 }
 0x266   :  { %1261 = vst [vmem:[%s2193_s5 + $0x150] sm:$0xff] %v1133_v16  ;;  %v1136_v20 = vadd.f32 %v1926_v57, %v1135_v0  ;;  %v1137_v21 = vpop.f32.mrb[75].mxu1 }
 0x268   :  { %1262 = vst [vmem:[%s2193_s5 + $0x158] sm:$0xff] %v1136_v20 }
 0x26b   :  { %v1140_v22 = vpop.f32.mrb[76].mxu1 }
 0x26c   :  { %v1141_v23 = vadd.f32 %v1926_v57, %v1140_v22  ;;  %v1142_v24 = vpop.f32.mrb[77].mxu1 }
 0x26d   :  { %v1143_v25 = vpop.f32.mrb[78].mxu1 }
 0x26e   :  { %1263 = vst [vmem:[%s2193_s5 + $0x160] sm:$0xff] %v1141_v23  ;;  %v1144_v26 = vadd.f32 %v1926_v57, %v1143_v25  ;;  %v1145_v44 = vpop.f32.mrb[79].mxu1 }
 0x270   :  { %1264 = vst [vmem:[%s2193_s5 + $0x168] sm:$0xff] %v1144_v26 }
 0x273   :  { %v1148_v45 = vpop.f32.mrb[80].mxu1 }
 0x274   :  { %v1149_v27 = vadd.f32 %v1926_v57, %v1148_v45  ;;  %v1150_v28 = vpop.f32.mrb[81].mxu1 }
 0x275   :  { %v1151_v29 = vpop.f32.mrb[82].mxu1 }
 0x276   :  { %1265 = vst [vmem:[%s2193_s5 + $0x170] sm:$0xff] %v1149_v27  ;;  %v1152_v63 = vadd.f32 %v1926_v57, %v1151_v29  ;;  %v1153_v30 = vpop.f32.mrb[83].mxu1 }
 0x278   :  { %1266 = vst [vmem:[%s2193_s5 + $0x178] sm:$0xff] %v1152_v63 }
 0x27b   :  { %v1156_v31 = vpop.f32.mrb[84].mxu1 }
 0x27c   :  { %v1157_v18 = vadd.f32 %v1926_v57, %v1156_v31  ;;  %v1158_v32 = vpop.f32.mrb[85].mxu1 }
 0x27d   :  { %v1159_v33 = vpop.f32.mrb[86].mxu1 }
 0x27e   :  { %1267 = vst [vmem:[%s2193_s5 + $0x180] sm:$0xff] %v1157_v18  ;;  %v1160_v36 = vadd.f32 %v1926_v57, %v1159_v33  ;;  %v1161_v37 = vpop.f32.mrb[87].mxu1 }
 0x280   :  { %1268 = vst [vmem:[%s2193_s5 + $0x188] sm:$0xff] %v1160_v36 }
 0x283   :  { %v1164_v38 = vpop.f32.mrb[88].mxu1 }
 0x284   :  { %v1165_v39 = vadd.f32 %v1926_v57, %v1164_v38  ;;  %v1166_v40 = vpop.f32.mrb[89].mxu1 }
 0x285   :  { %v1167_v41 = vpop.f32.mrb[90].mxu1 }
 0x286   :  { %1269 = vst [vmem:[%s2193_s5 + $0x190] sm:$0xff] %v1165_v39  ;;  %v1168_v42 = vadd.f32 %v1926_v57, %v1167_v41  ;;  %v1169_v43 = vpop.f32.mrb[91].mxu1 }
 0x288   :  { %1270 = vst [vmem:[%s2193_s5 + $0x198] sm:$0xff] %v1168_v42 }
 0x28b   :  { %v1172_v17 = vpop.f32.mrb[92].mxu1 }
 0x28c   :  { %v1173_v46 = vadd.f32 %v1926_v57, %v1172_v17  ;;  %v1174_v47 = vpop.f32.mrb[93].mxu1 }
 0x28d   :  { %v1175_v35 = vpop.f32.mrb[94].mxu1 }
 0x28e   :  { %1271 = vst [vmem:[%s2193_s5 + $0x1a0] sm:$0xff] %v1173_v46  ;;  %v1176_v48 = vadd.f32 %v1926_v57, %v1175_v35  ;;  %v1177_v49 = vpop.f32.mrb[95].mxu1 }
 0x290   :  { %1272 = vst [vmem:[%s2193_s5 + $0x1a8] sm:$0xff] %v1176_v48 }
 0x293   :  { %v1180_v50 = vpop.f32.mrb[96].mxu1 }
 0x294   :  { %v1181_v51 = vadd.f32 %v1926_v57, %v1180_v50  ;;  %v1182_v52 = vpop.f32.mrb[97].mxu1 }
 0x295   :  { %v1183_v53 = vpop.f32.mrb[98].mxu1 }
 0x296   :  { %1273 = vst [vmem:[%s2193_s5 + $0x1b0] sm:$0xff] %v1181_v51  ;;  %v1184_v54 = vadd.f32 %v1926_v57, %v1183_v53  ;;  %v1185_v55 = vpop.f32.mrb[99].mxu1 }
 0x298   :  { %1274 = vst [vmem:[%s2193_s5 + $0x1b8] sm:$0xff] %v1184_v54 }
 0x29b   :  { %v1188_v56 = vpop.f32.mrb[100].mxu1 }
 0x29c   :  { %v1189_v58 = vadd.f32 %v1926_v57, %v1188_v56  ;;  %v1190_v59 = vpop.f32.mrb[101].mxu1 }
 0x29d   :  { %v1191_v34 = vpop.f32.mrb[102].mxu1 }
 0x29e   :  { %1275 = vst [vmem:[%s2193_s5 + $0x1c0] sm:$0xff] %v1189_v58  ;;  %v1192_v60 = vadd.f32 %v1926_v57, %v1191_v34  ;;  %v1193_v1 = vpop.f32.mrb[103].mxu1 }
 0x2a0   :  { %1276 = vst [vmem:[%s2193_s5 + $0x1c8] sm:$0xff] %v1192_v60 }
 0x2a3   :  { %v1196_v61 = vpop.f32.mrb[104].mxu1 }
 0x2a4   :  { %v1197_v62 = vadd.f32 %v1926_v57, %v1196_v61  ;;  %v1198_v2 = vpop.f32.mrb[105].mxu1 }
 0x2a5   :  { %v1199_v3 = vpop.f32.mrb[106].mxu1 }
 0x2a6   :  { %1277 = vst [vmem:[%s2193_s5 + $0x1d0] sm:$0xff] %v1197_v62  ;;  %v1200_v4 = vadd.f32 %v1926_v57, %v1199_v3  ;;  %v1201_v5 = vpop.f32.mrb[107].mxu1 }
 0x2a8   :  { %1278 = vst [vmem:[%s2193_s5 + $0x1d8] sm:$0xff] %v1200_v4 }
 0x2ab   :  { %v1204_v6 = vpop.f32.mrb[108].mxu1 }
 0x2ac   :  { %v1205_v7 = vadd.f32 %v1926_v57, %v1204_v6  ;;  %v1206_v8 = vpop.f32.mrb[109].mxu1 }
 0x2ad   :  { %v1207_v9 = vpop.f32.mrb[110].mxu1 }
 0x2ae   :  { %1279 = vst [vmem:[%s2193_s5 + $0x1e0] sm:$0xff] %v1205_v7  ;;  %v1208_v10 = vadd.f32 %v1926_v57, %v1207_v9  ;;  %v1209_v11 = vpop.f32.mrb[111].mxu1 }
 0x2b0   :  { %1280 = vst [vmem:[%s2193_s5 + $0x1e8] sm:$0xff] %v1208_v10 }
 0x2b3   :  { %v1212_v12 = vpop.f32.mrb[112].mxu1 }
 0x2b4   :  { %v1213_v13 = vadd.f32 %v1926_v57, %v1212_v12  ;;  %v1214_v14 = vpop.f32.mrb[113].mxu1 }
 0x2b5   :  { %v1215_v15 = vpop.f32.mrb[114].mxu1 }
 0x2b6   :  { %1281 = vst [vmem:[%s2193_s5 + $0x1f0] sm:$0xff] %v1213_v13  ;;  %v1216_v16 = vadd.f32 %v1926_v57, %v1215_v15  ;;  %v1217_v19 = vpop.f32.mrb[115].mxu1 }
 0x2b8   :  { %1282 = vst [vmem:[%s2193_s5 + $0x1f8] sm:$0xff] %v1216_v16 }

</bundles_post_ra>
